<compile_context>
chip_gen: v7x
topology: tpu7x:2x2x1
jax: 0.10.0
libtpu: 0.0.40
codegen_flags: <defaults>
</compile_context>

<pallas_src>
import functools

import jax
import jax.numpy as jnp
from jax.experimental import pallas as pl
from jax.experimental.pallas import tpu as pltpu


def _round_up(v, m=128):
    return ((v + m - 1) // m) * m


def _compiler_params():
    return pltpu.CompilerParams(
        dimension_semantics=("parallel",),
        # Above the 16-32 MiB scoped default (review: larger blocks on v5e/v6e with
        # 128 MiB VMEM) but kept below v7x's 64 MiB physical VMEM.  Irrelevant at the
        # toy shapes in __main__.
        vmem_limit_bytes=48 * 1024 * 1024,
    )


# ----------------------------- Pallas kernels -----------------------------

def _conv_body(x_bf16, w_ref, mask_out_ref, z_ref, stats_ref, *, cin, wp, k, l_out):
    """Fused-im2col conv via a static tap-accumulation loop of k*k MXU dots.

    x_bf16       : [Cin, L_in] bf16 slab in row-padded flat layout (zero padding /
                   masking already applied by the caller)
    w_ref        : [Cout, k*k*Cin] bf16, tap-major columns
    mask_out_ref : [1, l_out] f32 valid-position mask for the OUTPUT layout
    z_ref        : (1, Cout, l_out) conv output (stored in the ref's dtype)
    stats_ref    : (1, Cout, 2) f32: lane0 = masked sum(z), lane1 = masked sum(z*z)
    """
    acc = None
    for di in range(k):
        for dj in range(k):
            tap = di * k + dj
            off = di * wp + dj                               # static lane offset per tap
            w_tap = w_ref[:, tap * cin:(tap + 1) * cin]      # [Cout, Cin] bf16
            x_tap = x_bf16[:, off:off + l_out]               # [Cin,  L]   bf16
            d = jnp.dot(w_tap, x_tap, preferred_element_type=jnp.float32)
            acc = d if acc is None else acc + d              # f32 accumulate on MXU path
    z_ref[0] = acc.astype(z_ref.dtype)

    # BN batch-statistics side outputs, masked so garbage / pad lanes are excluded.
    # Taken from the f32 accumulator, so they stay exact even when z is stored as bf16.
    m = mask_out_ref[...]                                    # [1, l_out]
    zm = acc * m
    s = jnp.sum(zm, axis=1, keepdims=True)                   # [Cout, 1]
    s2 = jnp.sum(zm * acc, axis=1, keepdims=True)            # [Cout, 1]
    stats_ref[0] = jnp.concatenate([s, s2], axis=1)          # [Cout, 2]


def _conv1_kernel(x_ref, w_ref, mo_ref, z_ref, st_ref, *, cin, wp, k, l_out):
    # conv1: the bf16 input slab already contains genuine zero padding (built in glue).
    _conv_body(x_ref[0], w_ref, mo_ref, z_ref, st_ref, cin=cin, wp=wp, k=k, l_out=l_out)


def _conv2_kernel(z1_ref, w_ref, s_ref, t_ref, mi_ref, mo_ref,
                  z_ref, st_ref, *, cin, wp, k, l_out):
    # Fused BN1-apply + ReLU + zero-pad mask on conv2's input path (a1 never hits HBM
    # in f32).  Elementwise math in f32, then ONE bf16 cast per slab (not per tap).
    a = jnp.maximum(z1_ref[0].astype(jnp.float32) * s_ref[...] + t_ref[...], 0.0)
    a = (a * mi_ref[...]).astype(jnp.bfloat16)
    _conv_body(a, w_ref, mo_ref, z_ref, st_ref, cin=cin, wp=wp, k=k, l_out=l_out)


# ------------------------------ JAX glue -----------------------------------

def _bn_scale_shift(stats, count, gamma, beta, eps=1e-5):
    """stats: [N, C, 2] (lane0=sum, lane1=sumsq per image) -> ([C,1] scale, [C,1] shift)."""
    s = jnp.sum(stats[:, :, 0], axis=0)
    s2 = jnp.sum(stats[:, :, 1], axis=0)
    mean = s / count
    var = jnp.maximum(s2 / count - mean * mean, 0.0)   # biased (training-mode) variance
    scale = gamma.astype(jnp.float32) * jax.lax.rsqrt(var + eps)
    shift = beta.astype(jnp.float32) - mean * scale
    return scale.reshape(-1, 1), shift.reshape(-1, 1)


def res_conv_forward(x_nchw, params, *, kernel_size=3, stride=1, padding=1):
    k = kernel_size
    assert stride == 1, "residual add requires a shape-preserving conv (stride=1)"
    assert k % 2 == 1 and padding == (k - 1) // 2, "requires 'same' zero padding"

    N, Cin, H, W = x_nchw.shape
    Chid = params["w1"].shape[0]
    P = padding
    Hp, Wp = H + 2 * P, W + 2 * P
    D = P * (Wp + 1)                      # flat-index shift of one (P, P) spatial step

    # lane-aligned flat lengths: z2 (margin 0) <- z1 (margin D) <- x (margin 2D)
    LPz2 = _round_up(H * Wp)              # conv2 output slab
    LPz1 = _round_up(LPz2 + 2 * D)        # conv1 output slab (conv2 reads a +2D halo)
    LPx = _round_up(LPz1 + 2 * D)         # input slab (conv1 reads a +2D halo)

    x = x_nchw.astype(jnp.float32)

    # input slab: zero-padded image flattened to Hp*Wp, placed at lane offset D,
    # cast to bf16 ONCE on the host (the MXU path is bf16 anyway; halves HBM/VMEM).
    #   -> valid pixel (h, w) of image n sits at x_lay[n, :, 2*D + h*Wp + w]
    xp = jnp.pad(x, ((0, 0), (0, 0), (P, P), (P, P))).reshape(N, Cin, Hp * Wp)
    x_lay = jnp.pad(xp, ((0, 0), (0, 0), (D, LPx - D - Hp * Wp))).astype(jnp.bfloat16)

    # valid-position masks for the z1 layout (margin D) and the z2 layout (margin 0)
    q1 = jnp.arange(LPz1)
    mask1 = ((q1 >= D) & ((q1 - D) // Wp < H) & ((q1 - D) % Wp < W))
    mask1 = mask1.astype(jnp.float32).reshape(1, LPz1)
    q2 = jnp.arange(LPz2)
    mask2 = ((q2 // Wp < H) & (q2 % Wp < W)).astype(jnp.float32).reshape(1, LPz2)

    # conv weights -> [Cout, k*k*Cin] with tap-major columns; bf16 for the MXU
    KK1, KK2 = k * k * Cin, k * k * Chid
    w1_2d = jnp.transpose(params["w1"].astype(jnp.float32), (0, 2, 3, 1)) \
               .reshape(Chid, KK1).astype(jnp.bfloat16)
    w2_2d = jnp.transpose(params["w2"].astype(jnp.float32), (0, 2, 3, 1)) \
               .reshape(Cin, KK2).astype(jnp.bfloat16)
    # NOTE: params["b2"] (conv2 bias) is intentionally unused — it cancels exactly
    # under batch-statistic BN2.

    cp = _compiler_params()

    # ---- conv1 (+ BN1 partial statistics); z1 stored in HBM as bf16 ----
    z1, st1 = pl.pallas_call(
        functools.partial(_conv1_kernel, cin=Cin, wp=Wp, k=k, l_out=LPz1),
        out_shape=(jax.ShapeDtypeStruct((N, Chid, LPz1), jnp.bfloat16),
                   jax.ShapeDtypeStruct((N, Chid, 2), jnp.float32)),
        grid=(N,),
        in_specs=[
            pl.BlockSpec((1, Cin, LPx), lambda n: (n, 0, 0)),
            pl.BlockSpec((Chid, KK1), lambda n: (0, 0)),
            pl.BlockSpec((1, LPz1), lambda n: (0, 0)),
        ],
        out_specs=(
            pl.BlockSpec((1, Chid, LPz1), lambda n: (n, 0, 0)),
            pl.BlockSpec((1, Chid, 2), lambda n: (n, 0, 0)),
        ),
        compiler_params=cp,
    )(x_lay, w1_2d, mask1)

    s1, t1 = _bn_scale_shift(st1, N * H * W, params["bn1_g"], params["bn1_b"])

    # ---- conv2 with fused BN1-apply + ReLU (+ BN2 partial statistics) ----
    z2, st2 = pl.pallas_call(
        functools.partial(_conv2_kernel, cin=Chid, wp=Wp, k=k, l_out=LPz2),
        out_shape=(jax.ShapeDtypeStruct((N, Cin, LPz2), jnp.float32),
                   jax.ShapeDtypeStruct((N, Cin, 2), jnp.float32)),
        grid=(N,),
        in_specs=[
            pl.BlockSpec((1, Chid, LPz1), lambda n: (n, 0, 0)),
            pl.BlockSpec((Cin, KK2), lambda n: (0, 0)),
            pl.BlockSpec((Chid, 1), lambda n: (0, 0)),
            pl.BlockSpec((Chid, 1), lambda n: (0, 0)),
            pl.BlockSpec((1, LPz1), lambda n: (0, 0)),
            pl.BlockSpec((1, LPz2), lambda n: (0, 0)),
        ],
        out_specs=(
            pl.BlockSpec((1, Cin, LPz2), lambda n: (n, 0, 0)),
            pl.BlockSpec((1, Cin, 2), lambda n: (n, 0, 0)),
        ),
        compiler_params=cp,
    )(z1, w2_2d, s1, t1, mask1, mask2)

    s2c, t2c = _bn_scale_shift(st2, N * H * W, params["bn2_g"], params["bn2_b"])

    # ---- BN2-apply + residual add + crop: one fused plain-XLA elementwise + slice ----
    # (reads z2 and x once, writes the final NCHW once; avoids the previous third
    #  pallas_call's extra output-sized HBM round trip.  Cropping inside a Pallas
    #  kernel would force masked vst since W is not a multiple of 128.)
    z2_img = z2[:, :, :H * Wp].reshape(N, Cin, H, Wp)[:, :, :, :W]
    out = z2_img * s2c.reshape(1, Cin, 1, 1) + t2c.reshape(1, Cin, 1, 1) + x
    return out


# ------------------------------- main ---------------------------------------

if __name__ == "__main__":
    ch_in, ch_hidden, kernel_size, stride, padding = 4, 8, 3, 1, 1
    N, H, W = 2, 16, 16

    key = jax.random.PRNGKey(0)
    k_x, k_w1, k_w2, k_b2, k_g1, k_b1, k_g2, k_b2n = jax.random.split(key, 8)

    x = jax.random.normal(k_x, (N, ch_in, H, W), dtype=jnp.float32)

    params = {
        # nn.Conv2d weight shapes: [out, in, k, k]
        "w1": 0.1 * jax.random.normal(k_w1, (ch_hidden, ch_in, kernel_size, kernel_size), jnp.float32),
        "w2": 0.1 * jax.random.normal(k_w2, (ch_in, ch_hidden, kernel_size, kernel_size), jnp.float32),
        # conv2 bias: exact no-op under batch-stat BN2 (kept for interface parity, unused)
        "b2": 0.1 * jax.random.normal(k_b2, (ch_in,), jnp.float32),
        # BatchNorm affine params (deterministic, non-trivial)
        "bn1_g": 1.0 + 0.1 * jax.random.normal(k_g1, (ch_hidden,), jnp.float32),
        "bn1_b": 0.1 * jax.random.normal(k_b1, (ch_hidden,), jnp.float32),
        "bn2_g": 1.0 + 0.1 * jax.random.normal(k_g2, (ch_in,), jnp.float32),
        "bn2_b": 0.1 * jax.random.normal(k_b2n, (ch_in,), jnp.float32),
    }

    fwd = jax.jit(functools.partial(res_conv_forward, kernel_size=kernel_size,
                                    stride=stride, padding=padding))
    out = jax.block_until_ready(fwd(x, params))
    assert out.shape == x.shape and out.dtype == jnp.float32
    assert bool(jnp.isfinite(out).all())
    print("KERNEL_OK")
</pallas_src>

<mosaic_0001>
module attributes {stable_mosaic.version = 11 : i64} {
  func.func @_conv1_kernel(%arg0: i32, %arg1: memref<1x4x640xbf16, #tpu.memory_space<vmem>>, %arg2: memref<8x36xbf16, #tpu.memory_space<vmem>>, %arg3: memref<1x512xf32, #tpu.memory_space<vmem>>, %arg4: memref<1x8x512xbf16, #tpu.memory_space<vmem>>, %arg5: memref<1x8x2xf32, #tpu.memory_space<vmem>>) attributes {dimension_semantics = [#tpu.dimension_semantics<parallel>], iteration_bounds = array<i64: 2>, scalar_prefetch = 0 : i64, scratch_operands = 0 : i64, tpu.core_type = #tpu.core_type<tc>, window_params = [{transform_indices = @transform_0, window_bounds = array<i64: 1, 4, 640>}, {pipeline_mode = #tpu.pipeline_mode<synchronous>, transform_indices = @transform_1, window_bounds = array<i64: 8, 36>}, {pipeline_mode = #tpu.pipeline_mode<synchronous>, transform_indices = @transform_2, window_bounds = array<i64: 1, 512>}, {transform_indices = @transform_3, window_bounds = array<i64: 1, 8, 512>}, {transform_indices = @transform_4, window_bounds = array<i64: 1, 8, 2>}]} {
    %c0 = arith.constant 0 : index
    %c0_0 = arith.constant 0 : index
    %c0_1 = arith.constant 0 : index
    %0 = vector.load %arg1[%c0, %c0_0, %c0_1] : memref<1x4x640xbf16, #tpu.memory_space<vmem>>, vector<1x4x640xbf16>
    %1 = vector.shape_cast %0 : vector<1x4x640xbf16> to vector<4x640xbf16>
    %c0_2 = arith.constant 0 : index
    %c0_3 = arith.constant 0 : index
    %2 = vector.load %arg2[%c0_2, %c0_3] : memref<8x36xbf16, #tpu.memory_space<vmem>>, vector<8x4xbf16>
    %3 = vector.extract_strided_slice %1 {offsets = [0, 0], sizes = [4, 512], strides = [1, 1]} : vector<4x640xbf16> to vector<4x512xbf16>
    %cst = arith.constant dense<0.000000e+00> : vector<8x512xf32>
    %4 = tpu.matmul %2, %3, %cst {dimension_numbers = #tpu.dot_dimension_numbers<[1], [0], [0], [1], [0, 0, 1, 1], [], []>} : vector<8x4xbf16>, vector<4x512xbf16>, vector<8x512xf32> -> vector<8x512xf32>
    %c0_4 = arith.constant 0 : index
    %c4 = arith.constant 4 : index
    %5 = vector.load %arg2[%c0_4, %c4] : memref<8x36xbf16, #tpu.memory_space<vmem>>, vector<8x4xbf16>
    %6 = vector.extract_strided_slice %1 {offsets = [0, 1], sizes = [4, 512], strides = [1, 1]} : vector<4x640xbf16> to vector<4x512xbf16>
    %cst_5 = arith.constant dense<0.000000e+00> : vector<8x512xf32>
    %7 = tpu.matmul %5, %6, %cst_5 {dimension_numbers = #tpu.dot_dimension_numbers<[1], [0], [0], [1], [0, 0, 1, 1], [], []>} : vector<8x4xbf16>, vector<4x512xbf16>, vector<8x512xf32> -> vector<8x512xf32>
    %8 = arith.addf %4, %7 : vector<8x512xf32>
    %c0_6 = arith.constant 0 : index
    %c8 = arith.constant 8 : index
    %9 = vector.load %arg2[%c0_6, %c8] : memref<8x36xbf16, #tpu.memory_space<vmem>>, vector<8x4xbf16>
    %10 = vector.extract_strided_slice %1 {offsets = [0, 2], sizes = [4, 512], strides = [1, 1]} : vector<4x640xbf16> to vector<4x512xbf16>
    %cst_7 = arith.constant dense<0.000000e+00> : vector<8x512xf32>
    %11 = tpu.matmul %9, %10, %cst_7 {dimension_numbers = #tpu.dot_dimension_numbers<[1], [0], [0], [1], [0, 0, 1, 1], [], []>} : vector<8x4xbf16>, vector<4x512xbf16>, vector<8x512xf32> -> vector<8x512xf32>
    %12 = arith.addf %8, %11 : vector<8x512xf32>
    %c0_8 = arith.constant 0 : index
    %c12 = arith.constant 12 : index
    %13 = vector.load %arg2[%c0_8, %c12] : memref<8x36xbf16, #tpu.memory_space<vmem>>, vector<8x4xbf16>
    %14 = vector.extract_strided_slice %1 {offsets = [0, 18], sizes = [4, 512], strides = [1, 1]} : vector<4x640xbf16> to vector<4x512xbf16>
    %cst_9 = arith.constant dense<0.000000e+00> : vector<8x512xf32>
    %15 = tpu.matmul %13, %14, %cst_9 {dimension_numbers = #tpu.dot_dimension_numbers<[1], [0], [0], [1], [0, 0, 1, 1], [], []>} : vector<8x4xbf16>, vector<4x512xbf16>, vector<8x512xf32> -> vector<8x512xf32>
    %16 = arith.addf %12, %15 : vector<8x512xf32>
    %c0_10 = arith.constant 0 : index
    %c16 = arith.constant 16 : index
    %17 = vector.load %arg2[%c0_10, %c16] : memref<8x36xbf16, #tpu.memory_space<vmem>>, vector<8x4xbf16>
    %18 = vector.extract_strided_slice %1 {offsets = [0, 19], sizes = [4, 512], strides = [1, 1]} : vector<4x640xbf16> to vector<4x512xbf16>
    %cst_11 = arith.constant dense<0.000000e+00> : vector<8x512xf32>
    %19 = tpu.matmul %17, %18, %cst_11 {dimension_numbers = #tpu.dot_dimension_numbers<[1], [0], [0], [1], [0, 0, 1, 1], [], []>} : vector<8x4xbf16>, vector<4x512xbf16>, vector<8x512xf32> -> vector<8x512xf32>
    %20 = arith.addf %16, %19 : vector<8x512xf32>
    %c0_12 = arith.constant 0 : index
    %c20 = arith.constant 20 : index
    %21 = vector.load %arg2[%c0_12, %c20] : memref<8x36xbf16, #tpu.memory_space<vmem>>, vector<8x4xbf16>
    %22 = vector.extract_strided_slice %1 {offsets = [0, 20], sizes = [4, 512], strides = [1, 1]} : vector<4x640xbf16> to vector<4x512xbf16>
    %cst_13 = arith.constant dense<0.000000e+00> : vector<8x512xf32>
    %23 = tpu.matmul %21, %22, %cst_13 {dimension_numbers = #tpu.dot_dimension_numbers<[1], [0], [0], [1], [0, 0, 1, 1], [], []>} : vector<8x4xbf16>, vector<4x512xbf16>, vector<8x512xf32> -> vector<8x512xf32>
    %24 = arith.addf %20, %23 : vector<8x512xf32>
    %c0_14 = arith.constant 0 : index
    %c24 = arith.constant 24 : index
    %25 = vector.load %arg2[%c0_14, %c24] : memref<8x36xbf16, #tpu.memory_space<vmem>>, vector<8x4xbf16>
    %26 = vector.extract_strided_slice %1 {offsets = [0, 36], sizes = [4, 512], strides = [1, 1]} : vector<4x640xbf16> to vector<4x512xbf16>
    %cst_15 = arith.constant dense<0.000000e+00> : vector<8x512xf32>
    %27 = tpu.matmul %25, %26, %cst_15 {dimension_numbers = #tpu.dot_dimension_numbers<[1], [0], [0], [1], [0, 0, 1, 1], [], []>} : vector<8x4xbf16>, vector<4x512xbf16>, vector<8x512xf32> -> vector<8x512xf32>
    %28 = arith.addf %24, %27 : vector<8x512xf32>
    %c0_16 = arith.constant 0 : index
    %c28 = arith.constant 28 : index
    %29 = vector.load %arg2[%c0_16, %c28] : memref<8x36xbf16, #tpu.memory_space<vmem>>, vector<8x4xbf16>
    %30 = vector.extract_strided_slice %1 {offsets = [0, 37], sizes = [4, 512], strides = [1, 1]} : vector<4x640xbf16> to vector<4x512xbf16>
    %cst_17 = arith.constant dense<0.000000e+00> : vector<8x512xf32>
    %31 = tpu.matmul %29, %30, %cst_17 {dimension_numbers = #tpu.dot_dimension_numbers<[1], [0], [0], [1], [0, 0, 1, 1], [], []>} : vector<8x4xbf16>, vector<4x512xbf16>, vector<8x512xf32> -> vector<8x512xf32>
    %32 = arith.addf %28, %31 : vector<8x512xf32>
    %c0_18 = arith.constant 0 : index
    %c32 = arith.constant 32 : index
    %33 = vector.load %arg2[%c0_18, %c32] : memref<8x36xbf16, #tpu.memory_space<vmem>>, vector<8x4xbf16>
    %34 = vector.extract_strided_slice %1 {offsets = [0, 38], sizes = [4, 512], strides = [1, 1]} : vector<4x640xbf16> to vector<4x512xbf16>
    %cst_19 = arith.constant dense<0.000000e+00> : vector<8x512xf32>
    %35 = tpu.matmul %33, %34, %cst_19 {dimension_numbers = #tpu.dot_dimension_numbers<[1], [0], [0], [1], [0, 0, 1, 1], [], []>} : vector<8x4xbf16>, vector<4x512xbf16>, vector<8x512xf32> -> vector<8x512xf32>
    %36 = arith.addf %32, %35 : vector<8x512xf32>
    %37 = arith.truncf %36 : vector<8x512xf32> to vector<8x512xbf16>
    %c0_20 = arith.constant 0 : index
    %c0_21 = arith.constant 0 : index
    %c0_22 = arith.constant 0 : index
    %38 = vector.load %arg4[%c0_20, %c0_21, %c0_22] : memref<1x8x512xbf16, #tpu.memory_space<vmem>>, vector<1x8x512xbf16>
    %39 = vector.shape_cast %38 : vector<1x8x512xbf16> to vector<8x512xbf16>
    %40 = vector.shape_cast %37 : vector<8x512xbf16> to vector<1x8x512xbf16>
    tpu.vector_store %arg4[%c0_20, %c0_21, %c0_22], %40 {strides = array<i32>} : memref<1x8x512xbf16, #tpu.memory_space<vmem>>, vector<1x8x512xbf16>,
    %c0_23 = arith.constant 0 : index
    %c0_24 = arith.constant 0 : index
    %41 = vector.load %arg3[%c0_23, %c0_24] : memref<1x512xf32, #tpu.memory_space<vmem>>, vector<1x512xf32>
    %42 = vector.broadcast %41 : vector<1x512xf32> to vector<8x512xf32>
    %43 = arith.mulf %36, %42 : vector<8x512xf32>
    %cst_25 = arith.constant dense<0.000000e+00> : vector<8xf32>
    %44 = vector.multi_reduction <add>, %43, %cst_25 [1] : vector<8x512xf32> to vector<8xf32>
    %45 = vector.shape_cast %44 : vector<8xf32> to vector<8x1xf32>
    %46 = arith.mulf %43, %36 : vector<8x512xf32>
    %cst_26 = arith.constant dense<0.000000e+00> : vector<8xf32>
    %47 = vector.multi_reduction <add>, %46, %cst_26 [1] : vector<8x512xf32> to vector<8xf32>
    %48 = vector.shape_cast %47 : vector<8xf32> to vector<8x1xf32>
    %49 = tpu.concatenate %45, %48 in 1 : vector<8x1xf32>, vector<8x1xf32> -> vector<8x2xf32>
    %c0_27 = arith.constant 0 : index
    %c0_28 = arith.constant 0 : index
    %c0_29 = arith.constant 0 : index
    %50 = vector.load %arg5[%c0_27, %c0_28, %c0_29] : memref<1x8x2xf32, #tpu.memory_space<vmem>>, vector<1x8x2xf32>
    %51 = vector.shape_cast %50 : vector<1x8x2xf32> to vector<8x2xf32>
    %52 = vector.shape_cast %49 : vector<8x2xf32> to vector<1x8x2xf32>
    tpu.vector_store %arg5[%c0_27, %c0_28, %c0_29], %52 {strides = array<i32>} : memref<1x8x2xf32, #tpu.memory_space<vmem>>, vector<1x8x2xf32>,
    return
  }
  func.func @transform_0(%arg0: i32) -> (i32, i32, i32) {
    %c0_i32 = arith.constant 0 : i32
    %c0_i32_0 = arith.constant 0 : i32
    %c0_i32_1 = arith.constant 0 : i32
    return %arg0, %c0_i32, %c0_i32_0 : i32, i32, i32
  }
  func.func @transform_1(%arg0: i32) -> (i32, i32) {
    %c0_i32 = arith.constant 0 : i32
    %c0_i32_0 = arith.constant 0 : i32
    %c0_i32_1 = arith.constant 0 : i32
    return %c0_i32, %c0_i32_0 : i32, i32
  }
  func.func @transform_2(%arg0: i32) -> (i32, i32) {
    %c0_i32 = arith.constant 0 : i32
    %c0_i32_0 = arith.constant 0 : i32
    %c0_i32_1 = arith.constant 0 : i32
    return %c0_i32, %c0_i32_0 : i32, i32
  }
  func.func @transform_3(%arg0: i32) -> (i32, i32, i32) {
    %c0_i32 = arith.constant 0 : i32
    %c0_i32_0 = arith.constant 0 : i32
    %c0_i32_1 = arith.constant 0 : i32
    return %arg0, %c0_i32, %c0_i32_0 : i32, i32, i32
  }
  func.func @transform_4(%arg0: i32) -> (i32, i32, i32) {
    %c0_i32 = arith.constant 0 : i32
    %c0_i32_0 = arith.constant 0 : i32
    %c0_i32_1 = arith.constant 0 : i32
    return %arg0, %c0_i32, %c0_i32_0 : i32, i32, i32
  }
}

module attributes {stable_mosaic.version = 11 : i64} {
  func.func @_conv2_kernel(%arg0: i32, %arg1: memref<1x8x512xbf16, #tpu.memory_space<vmem>>, %arg2: memref<4x72xbf16, #tpu.memory_space<vmem>>, %arg3: memref<8x1xf32, #tpu.memory_space<vmem>>, %arg4: memref<8x1xf32, #tpu.memory_space<vmem>>, %arg5: memref<1x512xf32, #tpu.memory_space<vmem>>, %arg6: memref<1x384xf32, #tpu.memory_space<vmem>>, %arg7: memref<1x4x384xf32, #tpu.memory_space<vmem>>, %arg8: memref<1x4x2xf32, #tpu.memory_space<vmem>>) attributes {dimension_semantics = [#tpu.dimension_semantics<parallel>], iteration_bounds = array<i64: 2>, scalar_prefetch = 0 : i64, scratch_operands = 0 : i64, tpu.core_type = #tpu.core_type<tc>, window_params = [{transform_indices = @transform_0, window_bounds = array<i64: 1, 8, 512>}, {pipeline_mode = #tpu.pipeline_mode<synchronous>, transform_indices = @transform_1, window_bounds = array<i64: 4, 72>}, {pipeline_mode = #tpu.pipeline_mode<synchronous>, transform_indices = @transform_2, window_bounds = array<i64: 8, 1>}, {pipeline_mode = #tpu.pipeline_mode<synchronous>, transform_indices = @transform_3, window_bounds = array<i64: 8, 1>}, {pipeline_mode = #tpu.pipeline_mode<synchronous>, transform_indices = @transform_4, window_bounds = array<i64: 1, 512>}, {pipeline_mode = #tpu.pipeline_mode<synchronous>, transform_indices = @transform_5, window_bounds = array<i64: 1, 384>}, {transform_indices = @transform_6, window_bounds = array<i64: 1, 4, 384>}, {transform_indices = @transform_7, window_bounds = array<i64: 1, 4, 2>}]} {
    %c0 = arith.constant 0 : index
    %c0_0 = arith.constant 0 : index
    %c0_1 = arith.constant 0 : index
    %0 = vector.load %arg1[%c0, %c0_0, %c0_1] : memref<1x8x512xbf16, #tpu.memory_space<vmem>>, vector<1x8x512xbf16>
    %1 = vector.shape_cast %0 : vector<1x8x512xbf16> to vector<8x512xbf16>
    %2 = arith.extf %1 : vector<8x512xbf16> to vector<8x512xf32>
    %c0_2 = arith.constant 0 : index
    %c0_3 = arith.constant 0 : index
    %3 = vector.load %arg3[%c0_2, %c0_3] : memref<8x1xf32, #tpu.memory_space<vmem>>, vector<8x1xf32>
    %4 = vector.broadcast %3 : vector<8x1xf32> to vector<8x512xf32>
    %5 = arith.mulf %2, %4 : vector<8x512xf32>
    %c0_4 = arith.constant 0 : index
    %c0_5 = arith.constant 0 : index
    %6 = vector.load %arg4[%c0_4, %c0_5] : memref<8x1xf32, #tpu.memory_space<vmem>>, vector<8x1xf32>
    %7 = vector.broadcast %6 : vector<8x1xf32> to vector<8x512xf32>
    %8 = arith.addf %5, %7 : vector<8x512xf32>
    %cst = arith.constant 0.000000e+00 : f32
    %9 = vector.broadcast %cst : f32 to vector<8x512xf32>
    %10 = arith.maximumf %8, %9 : vector<8x512xf32>
    %c0_6 = arith.constant 0 : index
    %c0_7 = arith.constant 0 : index
    %11 = vector.load %arg5[%c0_6, %c0_7] : memref<1x512xf32, #tpu.memory_space<vmem>>, vector<1x512xf32>
    %12 = vector.broadcast %11 : vector<1x512xf32> to vector<8x512xf32>
    %13 = arith.mulf %10, %12 : vector<8x512xf32>
    %14 = arith.truncf %13 : vector<8x512xf32> to vector<8x512xbf16>
    %c0_8 = arith.constant 0 : index
    %c0_9 = arith.constant 0 : index
    %15 = vector.load %arg2[%c0_8, %c0_9] : memref<4x72xbf16, #tpu.memory_space<vmem>>, vector<4x8xbf16>
    %16 = vector.extract_strided_slice %14 {offsets = [0, 0], sizes = [8, 384], strides = [1, 1]} : vector<8x512xbf16> to vector<8x384xbf16>
    %cst_10 = arith.constant dense<0.000000e+00> : vector<4x384xf32>
    %17 = tpu.matmul %15, %16, %cst_10 {dimension_numbers = #tpu.dot_dimension_numbers<[1], [0], [0], [1], [0, 0, 1, 1], [], []>} : vector<4x8xbf16>, vector<8x384xbf16>, vector<4x384xf32> -> vector<4x384xf32>
    %c0_11 = arith.constant 0 : index
    %c8 = arith.constant 8 : index
    %18 = vector.load %arg2[%c0_11, %c8] : memref<4x72xbf16, #tpu.memory_space<vmem>>, vector<4x8xbf16>
    %19 = vector.extract_strided_slice %14 {offsets = [0, 1], sizes = [8, 384], strides = [1, 1]} : vector<8x512xbf16> to vector<8x384xbf16>
    %cst_12 = arith.constant dense<0.000000e+00> : vector<4x384xf32>
    %20 = tpu.matmul %18, %19, %cst_12 {dimension_numbers = #tpu.dot_dimension_numbers<[1], [0], [0], [1], [0, 0, 1, 1], [], []>} : vector<4x8xbf16>, vector<8x384xbf16>, vector<4x384xf32> -> vector<4x384xf32>
    %21 = arith.addf %17, %20 : vector<4x384xf32>
    %c0_13 = arith.constant 0 : index
    %c16 = arith.constant 16 : index
    %22 = vector.load %arg2[%c0_13, %c16] : memref<4x72xbf16, #tpu.memory_space<vmem>>, vector<4x8xbf16>
    %23 = vector.extract_strided_slice %14 {offsets = [0, 2], sizes = [8, 384], strides = [1, 1]} : vector<8x512xbf16> to vector<8x384xbf16>
    %cst_14 = arith.constant dense<0.000000e+00> : vector<4x384xf32>
    %24 = tpu.matmul %22, %23, %cst_14 {dimension_numbers = #tpu.dot_dimension_numbers<[1], [0], [0], [1], [0, 0, 1, 1], [], []>} : vector<4x8xbf16>, vector<8x384xbf16>, vector<4x384xf32> -> vector<4x384xf32>
    %25 = arith.addf %21, %24 : vector<4x384xf32>
    %c0_15 = arith.constant 0 : index
    %c24 = arith.constant 24 : index
    %26 = vector.load %arg2[%c0_15, %c24] : memref<4x72xbf16, #tpu.memory_space<vmem>>, vector<4x8xbf16>
    %27 = vector.extract_strided_slice %14 {offsets = [0, 18], sizes = [8, 384], strides = [1, 1]} : vector<8x512xbf16> to vector<8x384xbf16>
    %cst_16 = arith.constant dense<0.000000e+00> : vector<4x384xf32>
    %28 = tpu.matmul %26, %27, %cst_16 {dimension_numbers = #tpu.dot_dimension_numbers<[1], [0], [0], [1], [0, 0, 1, 1], [], []>} : vector<4x8xbf16>, vector<8x384xbf16>, vector<4x384xf32> -> vector<4x384xf32>
    %29 = arith.addf %25, %28 : vector<4x384xf32>
    %c0_17 = arith.constant 0 : index
    %c32 = arith.constant 32 : index
    %30 = vector.load %arg2[%c0_17, %c32] : memref<4x72xbf16, #tpu.memory_space<vmem>>, vector<4x8xbf16>
    %31 = vector.extract_strided_slice %14 {offsets = [0, 19], sizes = [8, 384], strides = [1, 1]} : vector<8x512xbf16> to vector<8x384xbf16>
    %cst_18 = arith.constant dense<0.000000e+00> : vector<4x384xf32>
    %32 = tpu.matmul %30, %31, %cst_18 {dimension_numbers = #tpu.dot_dimension_numbers<[1], [0], [0], [1], [0, 0, 1, 1], [], []>} : vector<4x8xbf16>, vector<8x384xbf16>, vector<4x384xf32> -> vector<4x384xf32>
    %33 = arith.addf %29, %32 : vector<4x384xf32>
    %c0_19 = arith.constant 0 : index
    %c40 = arith.constant 40 : index
    %34 = vector.load %arg2[%c0_19, %c40] : memref<4x72xbf16, #tpu.memory_space<vmem>>, vector<4x8xbf16>
    %35 = vector.extract_strided_slice %14 {offsets = [0, 20], sizes = [8, 384], strides = [1, 1]} : vector<8x512xbf16> to vector<8x384xbf16>
    %cst_20 = arith.constant dense<0.000000e+00> : vector<4x384xf32>
    %36 = tpu.matmul %34, %35, %cst_20 {dimension_numbers = #tpu.dot_dimension_numbers<[1], [0], [0], [1], [0, 0, 1, 1], [], []>} : vector<4x8xbf16>, vector<8x384xbf16>, vector<4x384xf32> -> vector<4x384xf32>
    %37 = arith.addf %33, %36 : vector<4x384xf32>
    %c0_21 = arith.constant 0 : index
    %c48 = arith.constant 48 : index
    %38 = vector.load %arg2[%c0_21, %c48] : memref<4x72xbf16, #tpu.memory_space<vmem>>, vector<4x8xbf16>
    %39 = vector.extract_strided_slice %14 {offsets = [0, 36], sizes = [8, 384], strides = [1, 1]} : vector<8x512xbf16> to vector<8x384xbf16>
    %cst_22 = arith.constant dense<0.000000e+00> : vector<4x384xf32>
    %40 = tpu.matmul %38, %39, %cst_22 {dimension_numbers = #tpu.dot_dimension_numbers<[1], [0], [0], [1], [0, 0, 1, 1], [], []>} : vector<4x8xbf16>, vector<8x384xbf16>, vector<4x384xf32> -> vector<4x384xf32>
    %41 = arith.addf %37, %40 : vector<4x384xf32>
    %c0_23 = arith.constant 0 : index
    %c56 = arith.constant 56 : index
    %42 = vector.load %arg2[%c0_23, %c56] : memref<4x72xbf16, #tpu.memory_space<vmem>>, vector<4x8xbf16>
    %43 = vector.extract_strided_slice %14 {offsets = [0, 37], sizes = [8, 384], strides = [1, 1]} : vector<8x512xbf16> to vector<8x384xbf16>
    %cst_24 = arith.constant dense<0.000000e+00> : vector<4x384xf32>
    %44 = tpu.matmul %42, %43, %cst_24 {dimension_numbers = #tpu.dot_dimension_numbers<[1], [0], [0], [1], [0, 0, 1, 1], [], []>} : vector<4x8xbf16>, vector<8x384xbf16>, vector<4x384xf32> -> vector<4x384xf32>
    %45 = arith.addf %41, %44 : vector<4x384xf32>
    %c0_25 = arith.constant 0 : index
    %c64 = arith.constant 64 : index
    %46 = vector.load %arg2[%c0_25, %c64] : memref<4x72xbf16, #tpu.memory_space<vmem>>, vector<4x8xbf16>
    %47 = vector.extract_strided_slice %14 {offsets = [0, 38], sizes = [8, 384], strides = [1, 1]} : vector<8x512xbf16> to vector<8x384xbf16>
    %cst_26 = arith.constant dense<0.000000e+00> : vector<4x384xf32>
    %48 = tpu.matmul %46, %47, %cst_26 {dimension_numbers = #tpu.dot_dimension_numbers<[1], [0], [0], [1], [0, 0, 1, 1], [], []>} : vector<4x8xbf16>, vector<8x384xbf16>, vector<4x384xf32> -> vector<4x384xf32>
    %49 = arith.addf %45, %48 : vector<4x384xf32>
    %c0_27 = arith.constant 0 : index
    %c0_28 = arith.constant 0 : index
    %c0_29 = arith.constant 0 : index
    %50 = vector.load %arg7[%c0_27, %c0_28, %c0_29] : memref<1x4x384xf32, #tpu.memory_space<vmem>>, vector<1x4x384xf32>
    %51 = vector.shape_cast %50 : vector<1x4x384xf32> to vector<4x384xf32>
    %52 = vector.shape_cast %49 : vector<4x384xf32> to vector<1x4x384xf32>
    tpu.vector_store %arg7[%c0_27, %c0_28, %c0_29], %52 {strides = array<i32>} : memref<1x4x384xf32, #tpu.memory_space<vmem>>, vector<1x4x384xf32>,
    %c0_30 = arith.constant 0 : index
    %c0_31 = arith.constant 0 : index
    %53 = vector.load %arg6[%c0_30, %c0_31] : memref<1x384xf32, #tpu.memory_space<vmem>>, vector<1x384xf32>
    %54 = vector.broadcast %53 : vector<1x384xf32> to vector<4x384xf32>
    %55 = arith.mulf %49, %54 : vector<4x384xf32>
    %cst_32 = arith.constant dense<0.000000e+00> : vector<4xf32>
    %56 = vector.multi_reduction <add>, %55, %cst_32 [1] : vector<4x384xf32> to vector<4xf32>
    %57 = vector.shape_cast %56 : vector<4xf32> to vector<4x1xf32>
    %58 = arith.mulf %55, %49 : vector<4x384xf32>
    %cst_33 = arith.constant dense<0.000000e+00> : vector<4xf32>
    %59 = vector.multi_reduction <add>, %58, %cst_33 [1] : vector<4x384xf32> to vector<4xf32>
    %60 = vector.shape_cast %59 : vector<4xf32> to vector<4x1xf32>
    %61 = tpu.concatenate %57, %60 in 1 : vector<4x1xf32>, vector<4x1xf32> -> vector<4x2xf32>
    %c0_34 = arith.constant 0 : index
    %c0_35 = arith.constant 0 : index
    %c0_36 = arith.constant 0 : index
    %62 = vector.load %arg8[%c0_34, %c0_35, %c0_36] : memref<1x4x2xf32, #tpu.memory_space<vmem>>, vector<1x4x2xf32>
    %63 = vector.shape_cast %62 : vector<1x4x2xf32> to vector<4x2xf32>
    %64 = vector.shape_cast %61 : vector<4x2xf32> to vector<1x4x2xf32>
    tpu.vector_store %arg8[%c0_34, %c0_35, %c0_36], %64 {strides = array<i32>} : memref<1x4x2xf32, #tpu.memory_space<vmem>>, vector<1x4x2xf32>,
    return
  }
  func.func @transform_0(%arg0: i32) -> (i32, i32, i32) {
    %c0_i32 = arith.constant 0 : i32
    %c0_i32_0 = arith.constant 0 : i32
    %c0_i32_1 = arith.constant 0 : i32
    return %arg0, %c0_i32, %c0_i32_0 : i32, i32, i32
  }
  func.func @transform_1(%arg0: i32) -> (i32, i32) {
    %c0_i32 = arith.constant 0 : i32
    %c0_i32_0 = arith.constant 0 : i32
    %c0_i32_1 = arith.constant 0 : i32
    return %c0_i32, %c0_i32_0 : i32, i32
  }
  func.func @transform_2(%arg0: i32) -> (i32, i32) {
    %c0_i32 = arith.constant 0 : i32
    %c0_i32_0 = arith.constant 0 : i32
    %c0_i32_1 = arith.constant 0 : i32
    return %c0_i32, %c0_i32_0 : i32, i32
  }
  func.func @transform_3(%arg0: i32) -> (i32, i32) {
    %c0_i32 = arith.constant 0 : i32
    %c0_i32_0 = arith.constant 0 : i32
    %c0_i32_1 = arith.constant 0 : i32
    return %c0_i32, %c0_i32_0 : i32, i32
  }
  func.func @transform_4(%arg0: i32) -> (i32, i32) {
    %c0_i32 = arith.constant 0 : i32
    %c0_i32_0 = arith.constant 0 : i32
    %c0_i32_1 = arith.constant 0 : i32
    return %c0_i32, %c0_i32_0 : i32, i32
  }
  func.func @transform_5(%arg0: i32) -> (i32, i32) {
    %c0_i32 = arith.constant 0 : i32
    %c0_i32_0 = arith.constant 0 : i32
    %c0_i32_1 = arith.constant 0 : i32
    return %c0_i32, %c0_i32_0 : i32, i32
  }
  func.func @transform_6(%arg0: i32) -> (i32, i32, i32) {
    %c0_i32 = arith.constant 0 : i32
    %c0_i32_0 = arith.constant 0 : i32
    %c0_i32_1 = arith.constant 0 : i32
    return %arg0, %c0_i32, %c0_i32_0 : i32, i32, i32
  }
  func.func @transform_7(%arg0: i32) -> (i32, i32, i32) {
    %c0_i32 = arith.constant 0 : i32
    %c0_i32_0 = arith.constant 0 : i32
    %c0_i32_1 = arith.constant 0 : i32
    return %arg0, %c0_i32, %c0_i32_0 : i32, i32, i32
  }
}

</mosaic_0001>

<bundles_post_ra>
// kernel: res_conv_forward.2
= control target key start
LH: loop header
LB: loop body
LE: loop exit
PB: predicated region body
PF: predicated region fallthrough
CT: control target
= control target key end

     0   :  { %s1667_s15 = smov 0   ;;  %s1862_s0 = inlined_call_operand.vmem [shape: bf16[2,4,640], index: 0, kind: input, shape index: {}]   ;;  %s1863_s1 = inlined_call_operand.vmem [shape: bf16[8,36], index: 1, kind: input, shape index: {}]   ;;  %s1864_s2 = inlined_call_operand.vmem [shape: f32[1,512], index: 2, kind: input, shape index: {}]   ;;  %s1865_s3 = inlined_call_operand.vmem [shape: bf16[2,8,512], index: 3, kind: output, shape index: {0}]   ;;  %s1866_s4 = inlined_call_operand.vmem [shape: f32[2,8,2], index: 4, kind: output, shape index: {1}]  }
   0x1 LB: > { %s1457_s16 = sadd.s32 4294967295, %s1623_s15   ;;  %p1461_p0 = scmp.ge.s32.totalorder %s1623_s15, 1  ;;  %s1623_s15 = sphi %s1667_s15, %s15_s15  }
   0x2   : > { %p165_p1 = scmp.lt.s32.totalorder %s1623_s15, 3 }
   0x4   : > { %p166_p2 = pnand %p1461_p0, %p165_p1 }
   0x5   : > { %p195_p3 = scmp.lt.s32.totalorder (!%p166_p2), %s1457_s16, 1  ;;  %v224_v0 = vlaneseq (!%p166_p2)  ;;  %v1625_v1 = vmov (!%p166_p2), 1983009808   ;;  %s1626_s21 = smov (!%p166_p2), 127   ;;  %v1627_v11 = vmov (!%p166_p2), 0   ;;  %vm254_vm0 = vcmask (!%p166_p2), 1039360  }
   0x6   : > { %169 = sbr.rel (%p166_p2) target bundleno = 608 (0x260), region = 32  ;;  %v222_v2 = vunpack.c.l.s4 (!%p166_p2), %v1625_v1  ;;  %308 = vmatprep.mubr.bf16.mxu0 (!%p166_p2), %v1627_v11  ;;  %349 = vmatprep.mubr.bf16.mxu1 (!%p166_p2), %v1627_v11  ;;  %v1703_v13 = vld [vmem:[%s1863_s1] sm:$0xf] (!%p166_p2)  ;;  %s1628_s24 = smov (!%p166_p2), 124   ;;  %vm263_vm1 = vcmask (!%p166_p2), 1041408   ;;  %vm259_vm2 = vcmask (!%p166_p2), 31744  }
   0x7   : > { %v1677_v3 = vshrl.u32 (!%p166_p2), %v224_v0, 7  ;;  %v1466_v15 = vcombine.low (!%p166_p2), %v1703_v13, %v1703_v13  ;;  %s1629_s25 = smov (!%p166_p2), 126   ;;  %v1610_v16 = vld [vmem:[%s1863_s1] ss:$0 sps:$4 sm:$0xff] (!%p166_p2)   ;;  %s1630_s28 = smov (!%p166_p2), 120   ;;  %vm471_vm3 = vcmask (!%p166_p2), 1031168  }
   0x8   : > { %v223_v4 = vunpack.c.0.s8 (!%p166_p2), %v222_v2  ;;  %s1631_s29 = smov (!%p166_p2), 110   ;;  %v1611_v17 = vld [vmem:[%s1863_s1] ss:$0 sps:$4 sm:$0xff] (!%p166_p2)   ;;  %s1632_s6 = smov (!%p166_p2), 116   ;;  %vm593_vm4 = vcmask (!%p166_p2), 900096   ;;  %vm715_vm5 = vcmask (!%p166_p2), 891904  }
   0x9   : > { %s1633_s7 = smov (!%p166_p2), 109   ;;  %v1612_v18 = vld [vmem:[%s1863_s1] ss:$0 sps:$4 sm:$0xff] (!%p166_p2)   ;;  %s1634_s10 = smov (!%p166_p2), 112   ;;  %vm837_vm6 = vcmask (!%p166_p2), 883712   ;;  %vm959_vm7 = vcmask (!%p166_p2), 752640  }
   0xa   : > { %v226_v5 = vsub.s32 (!%p166_p2), %v223_v4, %v1677_v3  ;;  %s1635_s11 = smov (!%p166_p2), 108   ;;  %v1613_v19 = vld [vmem:[%s1863_s1] ss:$0 sps:$4 sm:$0xff] (!%p166_p2)   ;;  %s1636_s14 = smov (!%p166_p2), 92   ;;  %vm1081_vm8 = vcmask (!%p166_p2), 744448   ;;  %vm1203_vm9 = vcmask (!%p166_p2), 736256  }
   0xb   : > { %v1614_v20 = vld [vmem:[%s1863_s1] ss:$0 sps:$4 sm:$0xff] (!%p166_p2)   ;;  %s1637_s19 = smov (!%p166_p2), 104   ;;  %s1639_s23 = smov (!%p166_p2), 100   ;;  %vm1367_vm10 = vcmask (!%p166_p2), 7168   ;;  %vm1369_vm11 = vcmask (!%p166_p2), 15360  }
   0xc   : > { %v1615_v21 = vld [vmem:[%s1863_s1] ss:$0 sps:$4 sm:$0xff] (!%p166_p2)   ;;  %s1641_s27 = smov (!%p166_p2), 96  }
   0xd   : > { %s1868_s16 = smov (!%p195_p3, %s1457_s16), 1  ;;  %v1616_v22 = vld [vmem:[%s1863_s1] ss:$0 sps:$4 sm:$0xff]  }
   0xe   : > { %s1582_s17 = smul.u32 10, %s1868_s16  ;;  %s1515_s30 = sshll.u32 %s1868_s16, 4 }
   0xf   : > { %s1465_s8 = sshll.u32 %s1868_s16, 3 }
  0x10   : > { %s199_s20 = scalar_lea.vmem %s1862_s0, %s1582_s17 }
  0x11   : > { %v210_v6 = vld [vmem:[%s199_s20] sm:$0xff]  ;;  %v1706_v14 = vld.sshfl [vmem:[%s199_s20 + $0x8] sm:$0x3 pattern:$0x76325410]  ;;  %s1638_s20 = smov 91  }
  0x12   : > { %v1684_v7 = vrot.slane %v210_v6, %v226_v5  ;;  %v220_v8 = vcombine.high %v210_v6, %v210_v6 }
  0x14   : > { %244 = vrot.lane.b32.xlu0 %v1684_v7, %s1626_s21  ;;  %v1687_v9 = vrot.slane %v220_v8, %v226_v5  ;;  %v1691_v10 = vcombine.high %v1684_v7, %v1684_v7  ;;  %v362_v33 = vsel %vm263_vm1, %v1684_v7, 0 }
  0x16   : > { %248 = vrot.lane.b32.xlu1 %v1687_v9, %s1626_s21  ;;  %v1698_v12 = vcombine.high %v1687_v9, %v1687_v9  ;;  %v368_v37 = vsel %vm263_vm1, %v1687_v9, 0 }
  0x18   : > { %246 = vrot.lane.b32.xlu0 %v1691_v10, %s1626_s21 }
  0x1a   : > { %250 = vrot.lane.b32.xlu1 %v1698_v12, %s1626_s21 }
  0x1c   : > { %252 = vrot.lane.b32.xlu0 %v1706_v14, %s1626_s21 }
  0x1e   : > { %216 = vrot.lane.b32.xlu1 %v1466_v15, %s1628_s24  ;;  %s1640_s24 = smov 90  }
  0x20   : > { %461 = vrot.lane.b32.xlu0 %v1684_v7, %s1629_s25 }
  0x22   : > { %463 = vrot.lane.b32.xlu1 %v1691_v10, %s1629_s25 }
  0x24   : > { %465 = vrot.lane.b32.xlu0 %v1687_v9, %s1629_s25 }
  0x26   : > { %467 = vrot.lane.b32.xlu1 %v1698_v12, %s1629_s25 }
  0x28   : > { %469 = vrot.lane.b32.xlu0 %v1706_v14, %s1629_s25 }
  0x2a   : > { %459 = vrot.lane.b32.xlu1 %v1610_v16, %s1630_s28 }
  0x2c   : > { %583 = vrot.lane.b32.xlu0 %v1684_v7, %s1631_s29 }
  0x2e   : > { %585 = vrot.lane.b32.xlu1 %v1691_v10, %s1631_s29 }
  0x30   : > { %587 = vrot.lane.b32.xlu0 %v1687_v9, %s1631_s29 }
  0x32   : > { %589 = vrot.lane.b32.xlu1 %v1698_v12, %s1631_s29 }
  0x34   : > { %591 = vrot.lane.b32.xlu0 %v1706_v14, %s1631_s29 }
  0x36   : > { %581 = vrot.lane.b32.xlu1 %v1611_v17, %s1632_s6 }
  0x38   : > { %705 = vrot.lane.b32.xlu0 %v1684_v7, %s1633_s7 }
  0x3a   : > { %707 = vrot.lane.b32.xlu1 %v1691_v10, %s1633_s7 }
  0x3c   : > { %709 = vrot.lane.b32.xlu0 %v1687_v9, %s1633_s7 }
  0x3e   : > { %711 = vrot.lane.b32.xlu1 %v1698_v12, %s1633_s7 }
  0x40   : > { %713 = vrot.lane.b32.xlu0 %v1706_v14, %s1633_s7  ;;  %s204_s7 = scalar_lea.vmem %s1865_s3, %s1515_s30 }
  0x42   : > { %703 = vrot.lane.b32.xlu1 %v1612_v18, %s1634_s10 }
  0x44   : > { %827 = vrot.lane.b32.xlu0 %v1684_v7, %s1635_s11 }
  0x46   : > { %829 = vrot.lane.b32.xlu1 %v1691_v10, %s1635_s11 }
  0x48   : > { %831 = vrot.lane.b32.xlu0 %v1687_v9, %s1635_s11 }
  0x4a   : > { %833 = vrot.lane.b32.xlu1 %v1698_v12, %s1635_s11 }
  0x4c   : > { %835 = vrot.lane.b32.xlu0 %v1706_v14, %s1635_s11 }
  0x4e   : > { %825 = vrot.lane.b32.xlu1 %v1613_v19, %s1635_s11  ;;  %s208_s11 = scalar_lea.vmem %s1866_s4, %s1465_s8 }
  0x50   : > { %949 = vrot.lane.b32.xlu0 %v1684_v7, %s1636_s14 }
  0x52   : > { %951 = vrot.lane.b32.xlu1 %v1691_v10, %s1636_s14 }
  0x54   : > { %953 = vrot.lane.b32.xlu0 %v1687_v9, %s1636_s14 }
  0x56   : > { %955 = vrot.lane.b32.xlu1 %v1698_v12, %s1636_s14 }
  0x58   : > { %957 = vrot.lane.b32.xlu0 %v1706_v14, %s1636_s14 }
  0x5a   : > { %947 = vrot.lane.b32.xlu1 %v1614_v20, %s1637_s19 }
  0x5c   : > { %1071 = vrot.lane.b32.xlu0 %v1684_v7, %s1638_s20 }
  0x5e   : > { %1073 = vrot.lane.b32.xlu1 %v1691_v10, %s1638_s20 }
  0x60   : > { %1075 = vrot.lane.b32.xlu0 %v1687_v9, %s1638_s20 }
  0x62   : > { %1077 = vrot.lane.b32.xlu1 %v1698_v12, %s1638_s20 }
  0x64   : > { %1079 = vrot.lane.b32.xlu0 %v1706_v14, %s1638_s20 }
  0x66   : > { %1069 = vrot.lane.b32.xlu1 %v1615_v21, %s1639_s23 }
  0x68   : > { %1193 = vrot.lane.b32.xlu0 %v1684_v7, %s1640_s24 }
  0x6a   : > { %1195 = vrot.lane.b32.xlu1 %v1691_v10, %s1640_s24 }
  0x6c   : > { %1197 = vrot.lane.b32.xlu0 %v1687_v9, %s1640_s24 }
  0x6e   : > { %1199 = vrot.lane.b32.xlu1 %v1698_v12, %s1640_s24 }
  0x70   : > { %1201 = vrot.lane.b32.xlu0 %v1706_v14, %s1640_s24 }
  0x72   : > { %1191 = vrot.lane.b32.xlu1 %v1616_v22, %s1641_s27 }
  0x86   : > { %v245_v23 = vpop.permute.xlu0 %244 }
  0x88   : > { %v249_v24 = vpop.permute.xlu1 %248 }
  0x8a   : > { %v247_v25 = vpop.permute.xlu0 %246 }
  0x8b   : > { %v256_v26 = vsel %vm254_vm0, %v247_v25, %v249_v24  ;;  %v255_v27 = vsel %vm254_vm0, %v245_v23, %v247_v25 }
  0x8c   : > { %1468 = vmatprep.subr.msk.bf16.mxu0 %vm263_vm1, %v256_v26  ;;  %v251_v28 = vpop.permute.xlu1 %250  ;;  %v265_v29 = vsel %vm263_vm1, %v255_v27, 0 }
  0x8d   : > { %277 = vmatpush1.bf16.msra.mxu0 %v265_v29  ;;  %v257_v30 = vsel %vm254_vm0, %v249_v24, %v251_v28 }
  0x8e   : > { %v253_v31 = vpop.permute.xlu0 %252  ;;  %1472 = vmatprep.subr.msk.bf16.mxu0 %vm263_vm1, %v1691_v10  ;;  %v271_v35 = vsel %vm263_vm1, %v257_v30, 0 }
  0x8f   : > { %v258_v32 = vsel %vm254_vm0, %v251_v28, %v253_v31 }
  0x90   : > { %1470 = vmatprep.subr.msk.bf16.mxu1 %vm263_vm1, %v258_v32  ;;  %v217_v34 = vpop.permute.xlu1 %216 }
  0x91   : > { %1469 = vmatmul.mubr.msk.bf16.vlgmr.msra.gmra.mrb[0].mxu0 %vm259_vm2, %v217_v34  ;;  %318 = vmatpush1.bf16.msra.mxu1 %v271_v35 }
  0x92   : > { %374 = vmatpush1.bf16.msra.mxu0 %v362_v33  ;;  %1474 = vmatprep.subr.msk.bf16.mxu1 %vm263_vm1, %v1698_v12  ;;  %v462_v36 = vpop.permute.xlu0 %461 }
  0x93   : > { %405 = vmatprep.mubr.bf16.mxu0 %v1627_v11 }
  0x94   : > { %1471 = vmatmul.mubr.msk.bf16.vlgmr.msra.gmra.mrb[0].mxu1 %vm259_vm2, %v217_v34  ;;  %v464_v38 = vpop.permute.xlu1 %463 }
  0x95   : > { %415 = vmatpush1.bf16.msra.mxu1 %v368_v37  ;;  %446 = vmatprep.mubr.bf16.mxu1 %v1627_v11  ;;  %v472_v41 = vsel %vm471_vm3, %v462_v36, %v464_v38 }
  0x96   : > { %v466_v39 = vpop.permute.xlu0 %465  ;;  %v480_v44 = vsel %vm263_vm1, %v472_v41, 0 }
  0x97   : > { %v473_v40 = vsel %vm471_vm3, %v464_v38, %v466_v39 }
  0x98   : > { %v468_v42 = vpop.permute.xlu1 %467  ;;  %1477 = vmatprep.subr.msk.bf16.mxu0 %vm263_vm1, %v473_v40 }
  0x99   : > { %v474_v45 = vsel %vm471_vm3, %v466_v39, %v468_v42 }
  0x9a   : > { %v470_v43 = vpop.permute.xlu0 %469  ;;  %v486_v48 = vsel %vm263_vm1, %v474_v45, 0 }
  0x9b   : > { %v475_v46 = vsel %vm471_vm3, %v468_v42, %v470_v43 }
  0x9c   : > { %v460_v47 = vpop.permute.xlu1 %459  ;;  %1479 = vmatprep.subr.msk.bf16.mxu1 %vm263_vm1, %v475_v46 }
  0x9d   : > { %1473 = vmatmul.mubr.msk.bf16.vlgmr.msra.gmra.mrb[0].mxu0 %vm259_vm2, %v1703_v13 }
  0x9e   : > { %492 = vmatpush1.bf16.msra.mxu0 %v480_v44  ;;  %v584_v49 = vpop.permute.xlu0 %583  ;;  %523 = vmatprep.mubr.bf16.mxu0 %v1627_v11 }
  0xa0   : > { %1475 = vmatmul.mubr.msk.bf16.vlgmr.msra.gmra.mrb[0].mxu1 %vm259_vm2, %v1703_v13  ;;  %v586_v50 = vpop.permute.xlu1 %585 }
  0xa1   : > { %533 = vmatpush1.bf16.msra.mxu1 %v486_v48  ;;  %564 = vmatprep.mubr.bf16.mxu1 %v1627_v11  ;;  %v594_v53 = vsel %vm593_vm4, %v584_v49, %v586_v50 }
  0xa2   : > { %v588_v51 = vpop.permute.xlu0 %587  ;;  %v602_v56 = vsel %vm263_vm1, %v594_v53, 0 }
  0xa3   : > { %v595_v52 = vsel %vm593_vm4, %v586_v50, %v588_v51 }
  0xa4   : > { %v590_v54 = vpop.permute.xlu1 %589  ;;  %1482 = vmatprep.subr.msk.bf16.mxu0 %vm263_vm1, %v595_v52 }
  0xa5   : > { %v596_v57 = vsel %vm593_vm4, %v588_v51, %v590_v54 }
  0xa6   : > { %v592_v55 = vpop.permute.xlu0 %591  ;;  %v608_v60 = vsel %vm263_vm1, %v596_v57, 0 }
  0xa7   : > { %v597_v58 = vsel %vm593_vm4, %v590_v54, %v592_v55 }
  0xa8   : > { %v582_v59 = vpop.permute.xlu1 %581  ;;  %1484 = vmatprep.subr.msk.bf16.mxu1 %vm263_vm1, %v597_v58 }
  0xa9   : > { %1478 = vmatmul.mubr.msk.bf16.vlgmr.msra.gmra.mrb[0].mxu0 %vm259_vm2, %v460_v47 }
  0xaa   : > { %614 = vmatpush1.bf16.msra.mxu0 %v602_v56  ;;  %v706_v61 = vpop.permute.xlu0 %705  ;;  %645 = vmatprep.mubr.bf16.mxu0 %v1627_v11 }
  0xac   : > { %1480 = vmatmul.mubr.msk.bf16.vlgmr.msra.gmra.mrb[0].mxu1 %vm259_vm2, %v460_v47  ;;  %v708_v62 = vpop.permute.xlu1 %707 }
  0xad   : > { %655 = vmatpush1.bf16.msra.mxu1 %v608_v60  ;;  %686 = vmatprep.mubr.bf16.mxu1 %v1627_v11  ;;  %v716_v1 = vsel %vm715_vm5, %v706_v61, %v708_v62  ;;  %v1327_v60 = vld [vmem:[%s1864_s2] sm:$0xf]  ;;  %v1335_v61 = vsub.s32 1, %v1677_v3 }
  0xae   : > { %v710_v63 = vpop.permute.xlu0 %709  ;;  %v724_v5 = vsel %vm263_vm1, %v716_v1, 0 }
  0xaf   : > { %v717_v0 = vsel %vm715_vm5, %v708_v62, %v710_v63  ;;  %v1339_v62 = vsub.s32 2, %v1677_v3 }
  0xb0   : > { %v712_v2 = vpop.permute.xlu1 %711  ;;  %1487 = vmatprep.subr.msk.bf16.mxu0 %vm263_vm1, %v717_v0  ;;  %v1343_v0 = vsub.s32 3, %v1677_v3 }
  0xb1   : > { %v718_v6 = vsel %vm715_vm5, %v710_v63, %v712_v2 }
  0xb2   : > { %v714_v4 = vpop.permute.xlu0 %713  ;;  %v730_v9 = vsel %vm263_vm1, %v718_v6, 0  ;;  %v1344_v6 = vrot.slane %v1327_v60, %v1343_v0 }
  0xb3   : > { %v719_v7 = vsel %vm715_vm5, %v712_v2, %v714_v4  ;;  %v1340_v2 = vrot.slane %v1327_v60, %v1339_v62 }
  0xb4   : > { %v704_v8 = vpop.permute.xlu1 %703  ;;  %1489 = vmatprep.subr.msk.bf16.mxu1 %vm263_vm1, %v719_v7 }
  0xb5   : > { %1483 = vmatmul.mubr.msk.bf16.vlgmr.msra.gmra.mrb[0].mxu0 %vm259_vm2, %v582_v59 }
  0xb6   : > { %736 = vmatpush1.bf16.msra.mxu0 %v724_v5  ;;  %v828_v10 = vpop.permute.xlu0 %827  ;;  %767 = vmatprep.mubr.bf16.mxu0 %v1627_v11 }
  0xb8   : > { %1485 = vmatmul.mubr.msk.bf16.vlgmr.msra.gmra.mrb[0].mxu1 %vm259_vm2, %v582_v59  ;;  %v830_v12 = vpop.permute.xlu1 %829  ;;  %v1331_v59 = vsub.s32 0, %v1677_v3 }
  0xb9   : > { %777 = vmatpush1.bf16.msra.mxu1 %v730_v9  ;;  %808 = vmatprep.mubr.bf16.mxu1 %v1627_v11  ;;  %v838_v15 = vsel %vm837_vm6, %v828_v10, %v830_v12 }
  0xba   : > { %v832_v13 = vpop.permute.xlu0 %831  ;;  %v846_v18 = vsel %vm263_vm1, %v838_v15, 0  ;;  %v1332_v63 = vrot.slane %v1327_v60, %v1331_v59 }
  0xbb   : > { %v839_v14 = vsel %vm837_vm6, %v830_v12, %v832_v13 }
  0xbc   : > { %v834_v16 = vpop.permute.xlu1 %833  ;;  %1492 = vmatprep.subr.msk.bf16.mxu0 %vm263_vm1, %v839_v14 }
  0xbd   : > { %v840_v19 = vsel %vm837_vm6, %v832_v13, %v834_v16 }
  0xbe   : > { %v836_v17 = vpop.permute.xlu0 %835  ;;  %v852_v22 = vsel %vm263_vm1, %v840_v19, 0 }
  0xbf   : > { %v841_v20 = vsel %vm837_vm6, %v834_v16, %v836_v17 }
  0xc0   : > { %v826_v21 = vpop.permute.xlu1 %825  ;;  %1494 = vmatprep.subr.msk.bf16.mxu1 %vm263_vm1, %v841_v20 }
  0xc1   : > { %1488 = vmatmul.mubr.msk.bf16.vlgmr.msra.gmra.mrb[0].mxu0 %vm259_vm2, %v704_v8 }
  0xc2   : > { %858 = vmatpush1.bf16.msra.mxu0 %v846_v18  ;;  %v950_v23 = vpop.permute.xlu0 %949  ;;  %889 = vmatprep.mubr.bf16.mxu0 %v1627_v11 }
  0xc4   : > { %1490 = vmatmul.mubr.msk.bf16.vlgmr.msra.gmra.mrb[0].mxu1 %vm259_vm2, %v704_v8  ;;  %v952_v24 = vpop.permute.xlu1 %951 }
  0xc5   : > { %899 = vmatpush1.bf16.msra.mxu1 %v852_v22  ;;  %930 = vmatprep.mubr.bf16.mxu1 %v1627_v11  ;;  %v960_v27 = vsel %vm959_vm7, %v950_v23, %v952_v24 }
  0xc6   : > { %v954_v25 = vpop.permute.xlu0 %953  ;;  %v968_v30 = vsel %vm263_vm1, %v960_v27, 0 }
  0xc7   : > { %v961_v26 = vsel %vm959_vm7, %v952_v24, %v954_v25 }
  0xc8   : > { %v956_v28 = vpop.permute.xlu1 %955  ;;  %1497 = vmatprep.subr.msk.bf16.mxu0 %vm263_vm1, %v961_v26 }
  0xc9   : > { %v962_v31 = vsel %vm959_vm7, %v954_v25, %v956_v28 }
  0xca   : > { %v958_v29 = vpop.permute.xlu0 %957  ;;  %v974_v34 = vsel %vm263_vm1, %v962_v31, 0 }
  0xcb   : > { %v963_v32 = vsel %vm959_vm7, %v956_v28, %v958_v29 }
  0xcc   : > { %v948_v33 = vpop.permute.xlu1 %947  ;;  %1499 = vmatprep.subr.msk.bf16.mxu1 %vm263_vm1, %v963_v32 }
  0xcd   : > { %1493 = vmatmul.mubr.msk.bf16.vlgmr.msra.gmra.mrb[0].mxu0 %vm259_vm2, %v826_v21 }
  0xce   : > { %980 = vmatpush1.bf16.msra.mxu0 %v968_v30  ;;  %v1072_v35 = vpop.permute.xlu0 %1071  ;;  %1011 = vmatprep.mubr.bf16.mxu0 %v1627_v11 }
  0xd0   : > { %1495 = vmatmul.mubr.msk.bf16.vlgmr.msra.gmra.mrb[0].mxu1 %vm259_vm2, %v826_v21  ;;  %v1074_v36 = vpop.permute.xlu1 %1073 }
  0xd1   : > { %1021 = vmatpush1.bf16.msra.mxu1 %v974_v34  ;;  %1052 = vmatprep.mubr.bf16.mxu1 %v1627_v11  ;;  %v1082_v39 = vsel %vm1081_vm8, %v1072_v35, %v1074_v36 }
  0xd2   : > { %v1076_v37 = vpop.permute.xlu0 %1075  ;;  %v1090_v42 = vsel %vm263_vm1, %v1082_v39, 0 }
  0xd3   : > { %v1083_v38 = vsel %vm1081_vm8, %v1074_v36, %v1076_v37 }
  0xd4   : > { %v1078_v40 = vpop.permute.xlu1 %1077  ;;  %1502 = vmatprep.subr.msk.bf16.mxu0 %vm263_vm1, %v1083_v38 }
  0xd5   : > { %v1084_v43 = vsel %vm1081_vm8, %v1076_v37, %v1078_v40 }
  0xd6   : > { %v1080_v41 = vpop.permute.xlu0 %1079  ;;  %v1096_v46 = vsel %vm263_vm1, %v1084_v43, 0 }
  0xd7   : > { %v1085_v44 = vsel %vm1081_vm8, %v1078_v40, %v1080_v41 }
  0xd8   : > { %v1070_v45 = vpop.permute.xlu1 %1069  ;;  %1504 = vmatprep.subr.msk.bf16.mxu1 %vm263_vm1, %v1085_v44 }
  0xd9   : > { %1498 = vmatmul.mubr.msk.bf16.vlgmr.msra.gmra.mrb[0].mxu0 %vm259_vm2, %v948_v33 }
  0xda   : > { %1102 = vmatpush1.bf16.msra.mxu0 %v1090_v42  ;;  %v1194_v47 = vpop.permute.xlu0 %1193  ;;  %1133 = vmatprep.mubr.bf16.mxu0 %v1627_v11 }
  0xdc   : > { %1500 = vmatmul.mubr.msk.bf16.vlgmr.msra.gmra.mrb[0].mxu1 %vm259_vm2, %v948_v33  ;;  %v1196_v48 = vpop.permute.xlu1 %1195 }
  0xdd   : > { %1143 = vmatpush1.bf16.msra.mxu1 %v1096_v46  ;;  %1174 = vmatprep.mubr.bf16.mxu1 %v1627_v11  ;;  %v1204_v51 = vsel %vm1203_vm9, %v1194_v47, %v1196_v48 }
  0xde   : > { %v1198_v49 = vpop.permute.xlu0 %1197  ;;  %v1212_v54 = vsel %vm263_vm1, %v1204_v51, 0 }
  0xdf   : > { %v1205_v50 = vsel %vm1203_vm9, %v1196_v48, %v1198_v49 }
  0xe0   : > { %v1200_v52 = vpop.permute.xlu1 %1199  ;;  %1507 = vmatprep.subr.msk.bf16.mxu0 %vm263_vm1, %v1205_v50 }
  0xe1   : > { %v1206_v55 = vsel %vm1203_vm9, %v1198_v49, %v1200_v52 }
  0xe2   : > { %v1202_v53 = vpop.permute.xlu0 %1201  ;;  %v1218_v57 = vsel %vm263_vm1, %v1206_v55, 0 }
  0xe3   : > { %v1207_v56 = vsel %vm1203_vm9, %v1200_v52, %v1202_v53 }
  0xe4   : > { %1509 = vmatprep.subr.msk.bf16.mxu1 %vm263_vm1, %v1207_v56  ;;  %v1192_v58 = vpop.permute.xlu1 %1191 }
  0xe5   : > { %1503 = vmatmul.mubr.msk.bf16.vlgmr.msra.gmra.mrb[0].mxu0 %vm259_vm2, %v1070_v45 }
  0xe6   : > { %1224 = vmatpush1.bf16.msra.mxu0 %v1212_v54  ;;  %1255 = vmatprep.mubr.bf16.mxu0 %v1627_v11 }
  0xe8   : > { %1505 = vmatmul.mubr.msk.bf16.vlgmr.msra.gmra.mrb[0].mxu1 %vm259_vm2, %v1070_v45 }
  0xe9   : > { %1265 = vmatpush1.bf16.msra.mxu1 %v1218_v57  ;;  %1296 = vmatprep.mubr.bf16.mxu1 %v1627_v11  ;;  %v1336_v11 = vrot.slane %v1327_v60, %v1335_v61 }
  0xf1   : > { %1508 = vmatmul.mubr.msk.bf16.vlgmr.msra.gmra.mrb[0].mxu0 %vm259_vm2, %v1192_v58 }
  0xf4   : > { %1510 = vmatmul.mubr.msk.bf16.vlgmr.msra.gmra.mrb[0].mxu1 %vm259_vm2, %v1192_v58 }
 0x1c4   : > { %v1257_v1 = vpop.f32.mrb[0].mxu0 }
 0x1c5   : > { %v1349_v4 = vmul.f32 %v1332_v63, %v1257_v1  ;;  %v1259_v5 = vpop.f32.mrb[1].mxu0 }
 0x1c6   : > { %v1516_v7 = vpack.c.bf16 %v1259_v5, %v1257_v1  ;;  %v1350_v8 = vmul.f32 %v1336_v11, %v1259_v5  ;;  %v1261_v9 = vpop.f32.mrb[2].mxu0 }
 0x1c7   : > { %v1358_v10 = vmul.f32 %v1349_v4, %v1257_v1  ;;  %v1262_v12 = vpop.f32.mrb[3].mxu0  ;;  %v1298_v13 = vpop.f32.mrb[0].mxu1 }
 0x1c8   : > { %1325 = vst [vmem:[%s204_s7] sm:$0xff] %v1516_v7  ;;  %v1359_v14 = vmul.f32 %v1350_v8, %v1259_v5  ;;  %v1351_v3 = vmul.f32 %v1340_v2, %v1298_v13  ;;  %v1300_v15 = vpop.f32.mrb[1].mxu1  ;;  %v1353_v16 = vadd.f32 %v1350_v8, %v1349_v4 }
 0x1c9   : > { %v1517_v17 = vpack.c.bf16 %v1300_v15, %v1298_v13  ;;  %v1302_v18 = vpop.f32.mrb[2].mxu1  ;;  %v1352_v19 = vmul.f32 %v1344_v6, %v1300_v15 }
 0x1ca   : > { %v1360_v20 = vmul.f32 %v1351_v3, %v1298_v13  ;;  %v1303_v21 = vpop.f32.mrb[3].mxu1  ;;  %v1354_v22 = vadd.f32 %v1353_v16, %v1351_v3  ;;  %v1362_v23 = vadd.f32 %v1359_v14, %v1358_v10 }
 0x1cb   : > { %1326 = vst [vmem:[%s204_s7 + $0x8] sm:$0xff] %v1517_v17  ;;  %v1361_v24 = vmul.f32 %v1352_v19, %v1300_v15 }
 0x1cc   : > { %v1355_v25 = vadd.f32 %v1354_v22, %v1352_v19  ;;  %v1363_v26 = vadd.f32 %v1362_v23, %v1360_v20 }
 0x1ce   : > { %1356 = vadd.xlane.f32.xlu0 %v1355_v25  ;;  %v1364_v27 = vadd.f32 %v1363_v26, %v1361_v24 }
 0x1d0   : > { %1365 = vadd.xlane.f32.xlu1 %v1364_v27 }
 0x25b   : > { %v1357_v28 = vpop.xlane.xlu0 %1356 }
 0x25d   : > { %v1366_v29 = vpop.xlane.xlu1 %1365 }
 0x25e   : > { %v1368_v30 = vsel %vm1367_vm10, %v1357_v28, %v1366_v29 }
 0x25f   : > { %1370 = vst.msk [vmem:[%s208_s11] sm:$0xff] %vm1369_vm11, %v1368_v30 }
 0x260 PF: > { %s15_s15 = sadd.s32 1, %s1623_s15  }
 0x261   : > { %p12_p4 = scmp.ge.s32.totalorder %s15_s15, 4  }
 0x263   :  { %14 = sbr.rel (!%p12_p4) target bundleno = 1 (0x1), region = 74 }

// kernel: res_conv_forward.3
= control target key start
LH: loop header
LB: loop body
LE: loop exit
PB: predicated region body
PF: predicated region fallthrough
CT: control target
= control target key end

     0   :  { %s1812_s24 = smov 0   ;;  %s2018_s0 = inlined_call_operand.vmem [shape: bf16[2,8,512], index: 0, kind: input, shape index: {}]   ;;  %s2019_s1 = inlined_call_operand.vmem [shape: bf16[4,72], index: 1, kind: input, shape index: {}]   ;;  %s2020_s2 = inlined_call_operand.vmem [shape: f32[8,1], index: 2, kind: input, shape index: {}]   ;;  %s2021_s3 = inlined_call_operand.vmem [shape: f32[8,1], index: 3, kind: input, shape index: {}]   ;;  %s2022_s4 = inlined_call_operand.vmem [shape: f32[1,512], index: 4, kind: input, shape index: {}]   ;;  %s2023_s5 = inlined_call_operand.vmem [shape: f32[1,384], index: 5, kind: input, shape index: {}]   ;;  %s2024_s6 = inlined_call_operand.vmem [shape: f32[2,4,384], index: 6, kind: output, shape index: {0}]   ;;  %s2025_s7 = inlined_call_operand.vmem [shape: f32[2,4,2], index: 7, kind: output, shape index: {1}]  }
   0x1 LB: > { %s1532_s25 = sadd.s32 4294967295, %s1750_s24   ;;  %p1536_p0 = scmp.ge.s32.totalorder %s1750_s24, 1  ;;  %s1750_s24 = sphi %s1812_s24, %s18_s24  }
   0x2   : > { %p240_p1 = scmp.lt.s32.totalorder %s1750_s24, 3 }
   0x4   : > { %p241_p2 = pnand %p1536_p0, %p240_p1 }
   0x5   : > { %v297_v0 = vld [vmem:[%s2020_s2] sm:$0xff] (!%p241_p2)  ;;  %v1752_v1 = vmov (!%p241_p2), 0   ;;  %p276_p3 = scmp.lt.s32.totalorder (!%p241_p2), %s1532_s25, 1  ;;  %v323_v3 = vlaneseq (!%p241_p2)  ;;  %v1753_v13 = vmov (!%p241_p2), 1983009808   ;;  %v1754_v38 = vmov (!%p241_p2), 0.0  }
   0x6   : > { %244 = sbr.rel (%p241_p2) target bundleno = 734 (0x2de), region = 44  ;;  %1743 = vset.pattern.permute.xlu0 (!%p241_p2), %v1752_v1  ;;  %424 = vmatprep.mubr.bf16.mxu0 (!%p241_p2), %v1752_v1  ;;  %v307_v2 = vld [vmem:[%s2021_s3] sm:$0xff] (!%p241_p2)  ;;  %v354_v14 = vunpack.c.l.s4 (!%p241_p2), %v1753_v13  ;;  %s1755_s15 = smov (!%p241_p2), 127   ;;  %vm1756_vm0 = vmmov (!%p241_p2), 0   ;;  %vm374_vm1 = vcmask (!%p241_p2), 1039360   ;;  %vm382_vm2 = vcmask (!%p241_p2), 1043456  }
   0x7   : > { %300 = vperm.xlu0 (!%p241_p2), %1743, %v297_v0   ;;  %v1834_v6 = vshrl.u32 (!%p241_p2), %v323_v3, 7  ;;  %v321_v16 = vld [vmem:[%s2022_s4] sm:$0xf] (!%p241_p2)  ;;  %1596 = vmatprep.subr.bf16.mxu1 (!%p241_p2), %v1754_v38  ;;  %s1757_s16 = smov (!%p241_p2), 120   ;;  %s1758_s17 = smov (!%p241_p2), 126   ;;  %vm378_vm3 = vcmask (!%p241_p2), 64512  }
   0x8   : > { %v355_v24 = vunpack.c.0.s8 (!%p241_p2), %v354_v14  ;;  %v1854_v40 = vld [vmem:[%s2019_s1] sm:$0x3] (!%p241_p2)  ;;  %1598 = vmatprep.mubr.msk.bf16.mxu1 (!%p241_p2), %vm1756_vm0, %v1754_v38  ;;  %s1759_s18 = smov (!%p241_p2), 110   ;;  %s1760_s21 = smov (!%p241_p2), 112   ;;  %vm585_vm4 = vcmask (!%p241_p2), 1031168   ;;  %vm704_vm5 = vcmask (!%p241_p2), 900096  }
   0x9   : > { %v325_v11 = vsub.s32 (!%p241_p2), 0, %v1834_v6  ;;  %v333_v12 = vsub.s32 (!%p241_p2), 2, %v1834_v6  ;;  %v329_v17 = vsub.s32 (!%p241_p2), 1, %v1834_v6  ;;  %v337_v30 = vsub.s32 (!%p241_p2), 3, %v1834_v6  ;;  %s1761_s22 = smov (!%p241_p2), 104   ;;  %s1762_s23 = smov (!%p241_p2), 109  }
   0xa   : > { %v358_v37 = vsub.s32 (!%p241_p2), %v355_v24, %v1834_v6  ;;  %v1547_v49 = vld.sshfl [vmem:[%s2019_s1] sm:$0x3 pattern:$0x76325410] (!%p241_p2)  ;;  %s1763_s26 = smov (!%p241_p2), 108   ;;  %s1764_s27 = smov (!%p241_p2), 96  }
   0xb   : > { %310 = vperm.xlu0 (!%p241_p2), %1743, %v307_v2   ;;  %v326_v21 = vrot.slane (!%p241_p2), %v321_v16, %v325_v11  ;;  %v334_v22 = vrot.slane (!%p241_p2), %v321_v16, %v333_v12  ;;  %v330_v29 = vrot.slane (!%p241_p2), %v321_v16, %v329_v17  ;;  %v338_v39 = vrot.slane (!%p241_p2), %v321_v16, %v337_v30  ;;  %s1765_s28 = smov (!%p241_p2), 88   ;;  %s1766_s29 = smov (!%p241_p2), 92  }
   0xc   : > { %v359_v45 = vrot.slane (!%p241_p2), %v1854_v40, %v358_v37  ;;  %s1768_s8 = smov (!%p241_p2), 80   ;;  %s1769_s9 = smov (!%p241_p2), 72   ;;  %vm823_vm6 = vcmask (!%p241_p2), 891904   ;;  %vm942_vm7 = vcmask (!%p241_p2), 883712   ;;  %vm1061_vm8 = vcmask (!%p241_p2), 752640  }
   0xd   : > { %s2027_s25 = smov (!%p276_p3, %s1532_s25), 1  ;;  %s1771_s11 = smov 64   ;;  %vm1180_vm9 = vcmask 744448   ;;  %vm1299_vm10 = vcmask 736256   ;;  %vm1442_vm11 = vcmask 7168   ;;  %vm1444_vm12 = vcmask 11264  }
   0xe   : > { %s1577_s30 = sshll.u32 %s2027_s25, 4  ;;  %s1714_s14 = smul.u32 12, %s2027_s25 }
   0xf   : > { %s280_s10 = scalar_lea.vmem %s2018_s0, %s1577_s30  ;;  %s1767_s30 = smov 91  }
  0x10   : > { %v291_v4 = vld [vmem:[%s280_s10] sm:$0xff]  ;;  %v292_v5 = vld [vmem:[%s280_s10 + $0x8] sm:$0xff]  ;;  %s1770_s10 = smov 90  }
  0x11   : > { %v293_v7 = vunpack.c.l.bf16 %v291_v4  ;;  %v294_v8 = vunpack.c.h.bf16 %v291_v4  ;;  %v295_v9 = vunpack.c.l.bf16 %v292_v5  ;;  %v296_v15 = vunpack.c.h.bf16 %v292_v5 }
  0x86   : > { %v301_v10 = vpop.permute.xlu0 %300 }
  0x87   : > { %v303_v18 = vmul.f32 %v301_v10, %v293_v7  ;;  %v304_v19 = vmul.f32 %v301_v10, %v294_v8  ;;  %v305_v20 = vmul.f32 %v301_v10, %v295_v9  ;;  %v306_v25 = vmul.f32 %v301_v10, %v296_v15 }
  0x8a   : > { %v311_v23 = vpop.permute.xlu0 %310 }
  0x8b   : > { %v313_v26 = vadd.f32 %v311_v23, %v303_v18  ;;  %v314_v27 = vadd.f32 %v311_v23, %v304_v19  ;;  %v315_v28 = vadd.f32 %v311_v23, %v305_v20  ;;  %v316_v31 = vadd.f32 %v311_v23, %v306_v25 }
  0x8d   : > { %v317_v32 = vmax.f32 %v313_v26, 0.0  ;;  %v318_v33 = vmax.f32 %v314_v27, 0.0  ;;  %v319_v34 = vmax.f32 %v315_v28, 0.0  ;;  %v320_v41 = vmax.f32 %v316_v31, 0.0 }
  0x8f   : > { %v343_v35 = vmul.f32 %v326_v21, %v317_v32  ;;  %v345_v36 = vmul.f32 %v334_v22, %v319_v34  ;;  %v344_v42 = vmul.f32 %v330_v29, %v318_v33  ;;  %v346_v46 = vmul.f32 %v338_v39, %v320_v41 }
  0x91   : > { %v1856_v43 = vpack.c.bf16 %v343_v35, %v343_v35  ;;  %v1858_v44 = vpack.c.bf16 %v345_v36, %v345_v36  ;;  %v1865_v47 = vpack.c.bf16 %v344_v42, %v344_v42  ;;  %v350_v48 = vpack.c.bf16 %v346_v46, %v346_v46 }
  0x93   : > { %370 = vrot.lane.b32.xlu0 %v1858_v44, %s1755_s15  ;;  %366 = vrot.lane.b32.xlu1 %v1856_v43, %s1755_s15  ;;  %v477_v61 = vsel %vm382_vm2, %v1856_v43, 0  ;;  %v483_v0 = vsel %vm382_vm2, %v1858_v44, 0 }
  0x97   : > { %360 = vrot.lane.b32.xlu0 %v359_v45, %s1757_s16  ;;  %368 = vrot.lane.b32.xlu1 %v1865_v47, %s1755_s15 }
  0x9b   : > { %579 = vrot.lane.b32.xlu0 %v1865_v47, %s1758_s17  ;;  %372 = vrot.lane.b32.xlu1 %v350_v48, %s1755_s15 }
  0x9f   : > { %583 = vrot.lane.b32.xlu0 %v350_v48, %s1758_s17  ;;  %577 = vrot.lane.b32.xlu1 %v1856_v43, %s1758_s17 }
  0xa3   : > { %696 = vrot.lane.b32.xlu0 %v1856_v43, %s1759_s18  ;;  %581 = vrot.lane.b32.xlu1 %v1858_v44, %s1758_s17  ;;  %s285_s17 = scalar_lea.vmem %s2024_s6, %s1714_s14 }
  0xa7   : > { %700 = vrot.lane.b32.xlu0 %v1858_v44, %s1759_s18  ;;  %575 = vrot.lane.b32.xlu1 %v1547_v49, %s1760_s21 }
  0xab   : > { %694 = vrot.lane.b32.xlu0 %v1547_v49, %s1761_s22  ;;  %698 = vrot.lane.b32.xlu1 %v1865_v47, %s1759_s18 }
  0xaf   : > { %817 = vrot.lane.b32.xlu0 %v1865_v47, %s1762_s23  ;;  %702 = vrot.lane.b32.xlu1 %v350_v48, %s1759_s18  ;;  %s1540_s18 = sshll.u32 %s2027_s25, 2 }
  0xb0   : > { %s289_s21 = scalar_lea.vmem %s2025_s7, %s1540_s18 }
  0xb3   : > { %821 = vrot.lane.b32.xlu0 %v350_v48, %s1762_s23  ;;  %815 = vrot.lane.b32.xlu1 %v1856_v43, %s1762_s23 }
  0xb7   : > { %934 = vrot.lane.b32.xlu0 %v1856_v43, %s1763_s26  ;;  %819 = vrot.lane.b32.xlu1 %v1858_v44, %s1762_s23 }
  0xbb   : > { %938 = vrot.lane.b32.xlu0 %v1858_v44, %s1763_s26  ;;  %813 = vrot.lane.b32.xlu1 %v1547_v49, %s1764_s27 }
  0xbf   : > { %932 = vrot.lane.b32.xlu0 %v1547_v49, %s1765_s28  ;;  %936 = vrot.lane.b32.xlu1 %v1865_v47, %s1763_s26 }
  0xc3   : > { %1055 = vrot.lane.b32.xlu0 %v1865_v47, %s1766_s29  ;;  %940 = vrot.lane.b32.xlu1 %v350_v48, %s1763_s26 }
  0xc7   : > { %1059 = vrot.lane.b32.xlu0 %v350_v48, %s1766_s29  ;;  %1053 = vrot.lane.b32.xlu1 %v1856_v43, %s1766_s29 }
  0xcb   : > { %1172 = vrot.lane.b32.xlu0 %v1856_v43, %s1767_s30  ;;  %1057 = vrot.lane.b32.xlu1 %v1858_v44, %s1766_s29 }
  0xcf   : > { %1176 = vrot.lane.b32.xlu0 %v1858_v44, %s1767_s30  ;;  %1051 = vrot.lane.b32.xlu1 %v1547_v49, %s1768_s8 }
  0xd3   : > { %1170 = vrot.lane.b32.xlu0 %v1547_v49, %s1769_s9  ;;  %1174 = vrot.lane.b32.xlu1 %v1865_v47, %s1767_s30 }
  0xd7   : > { %1293 = vrot.lane.b32.xlu0 %v1865_v47, %s1770_s10  ;;  %1178 = vrot.lane.b32.xlu1 %v350_v48, %s1767_s30 }
  0xdb   : > { %1297 = vrot.lane.b32.xlu0 %v350_v48, %s1770_s10  ;;  %1291 = vrot.lane.b32.xlu1 %v1856_v43, %s1770_s10 }
  0xdf   : > { %1295 = vrot.lane.b32.xlu1 %v1858_v44, %s1770_s10 }
  0xe3   : > { %1289 = vrot.lane.b32.xlu1 %v1547_v49, %s1771_s11 }
 0x105   : > { %v371_v50 = vpop.permute.xlu0 %370  ;;  %v367_v51 = vpop.permute.xlu1 %366 }
 0x109   : > { %v361_v52 = vpop.permute.xlu0 %360  ;;  %v369_v53 = vpop.permute.xlu1 %368 }
 0x10a   : > { %v376_v54 = vsel %vm374_vm1, %v369_v53, %v371_v50  ;;  %v375_v55 = vsel %vm374_vm1, %v367_v51, %v369_v53 }
 0x10b   : > { %1541 = vmatprep.subr.msk.bf16.mxu0 %vm382_vm2, %v376_v54  ;;  %v384_v56 = vsel %vm382_vm2, %v375_v55, 0 }
 0x10c   : > { %393 = vmatpush1.bf16.msra.mxu0 %v384_v56 }
 0x10d   : > { %v580_v57 = vpop.permute.xlu0 %579  ;;  %1544 = vmatprep.subr.msk.bf16.mxu0 %vm382_vm2, %v1865_v47  ;;  %v373_v58 = vpop.permute.xlu1 %372 }
 0x10e   : > { %v377_v59 = vsel %vm374_vm1, %v371_v50, %v373_v58 }
 0x10f   : > { %1542 = vmatmul.mubr.msk.bf16.vlgmr.msra.gmra.mrb[0].mxu0 %vm378_vm3, %v361_v52  ;;  %v390_v60 = vsel %vm382_vm2, %v377_v59, 0 }
 0x110   : > { %1597 = vmatpush3.bf16.msra.mxu1 %v390_v60  ;;  %486 = vmatpush1.bf16.msra.mxu0 %v477_v61 }
 0x111   : > { %v584_v62 = vpop.permute.xlu0 %583  ;;  %v578_v63 = vpop.permute.xlu1 %577  ;;  %1602 = vmatprep.subr.bf16.mxu1 %v1754_v38  ;;  %517 = vmatprep.mubr.bf16.mxu0 %v1752_v1 }
 0x112   : > { %v586_v5 = vsel %vm585_vm4, %v578_v63, %v580_v57 }
 0x113   : > { %1599 = vmatmul.mubr.msk.bf16.vlgmr.msra.gmra.mrb[0].mxu1 %vm378_vm3, %v361_v52  ;;  %v593_v9 = vsel %vm382_vm2, %v586_v5, 0 }
 0x114   : > { %1603 = vmatpush3.bf16.msra.mxu1 %v483_v0  ;;  %1604 = vmatprep.mubr.msk.bf16.mxu1 %vm1756_vm0, %v1754_v38 }
 0x115   : > { %v697_v2 = vpop.permute.xlu0 %696  ;;  %v582_v3 = vpop.permute.xlu1 %581  ;;  %1608 = vmatprep.subr.bf16.mxu1 %v1754_v38 }
 0x116   : > { %v587_v4 = vsel %vm585_vm4, %v580_v57, %v582_v3  ;;  %v588_v10 = vsel %vm585_vm4, %v582_v3, %v584_v62 }
 0x117   : > { %1548 = vmatprep.subr.msk.bf16.mxu0 %vm382_vm2, %v587_v4  ;;  %v599_v16 = vsel %vm382_vm2, %v588_v10, 0 }
 0x119   : > { %v701_v7 = vpop.permute.xlu0 %700  ;;  %v576_v8 = vpop.permute.xlu1 %575 }
 0x11b   : > { %1545 = vmatmul.mubr.msk.bf16.vlgmr.msra.gmra.mrb[0].mxu0 %vm378_vm3, %v1854_v40 }
 0x11c   : > { %602 = vmatpush1.bf16.msra.mxu0 %v593_v9  ;;  %633 = vmatprep.mubr.bf16.mxu0 %v1752_v1 }
 0x11d   : > { %v695_v13 = vpop.permute.xlu0 %694  ;;  %v699_v14 = vpop.permute.xlu1 %698 }
 0x11e   : > { %v706_v15 = vsel %vm704_vm5, %v699_v14, %v701_v7  ;;  %v705_v20 = vsel %vm704_vm5, %v697_v2, %v699_v14  ;;  %v1405_v14 = vld [vmem:[%s2023_s5] sm:$0x7] }
 0x11f   : > { %1605 = vmatmul.mubr.msk.bf16.vlgmr.msra.gmra.mrb[0].mxu1 %vm378_vm3, %v1854_v40  ;;  %1552 = vmatprep.subr.msk.bf16.mxu0 %vm382_vm2, %v706_v15  ;;  %v712_v23 = vsel %vm382_vm2, %v705_v20, 0  ;;  %v1414_v15 = vrot.slane %v1405_v14, %v329_v17 }
 0x120   : > { %1609 = vmatpush3.bf16.msra.mxu1 %v599_v16  ;;  %1610 = vmatprep.mubr.msk.bf16.mxu1 %vm1756_vm0, %v1754_v38 }
 0x121   : > { %v818_v18 = vpop.permute.xlu0 %817  ;;  %v703_v19 = vpop.permute.xlu1 %702  ;;  %1614 = vmatprep.subr.bf16.mxu1 %v1754_v38 }
 0x122   : > { %v707_v24 = vsel %vm704_vm5, %v701_v7, %v703_v19 }
 0x123   : > { %v718_v28 = vsel %vm382_vm2, %v707_v24, 0 }
 0x125   : > { %v822_v21 = vpop.permute.xlu0 %821  ;;  %v816_v22 = vpop.permute.xlu1 %815 }
 0x126   : > { %v824_v31 = vsel %vm823_vm6, %v816_v22, %v818_v18 }
 0x127   : > { %1549 = vmatmul.mubr.msk.bf16.vlgmr.msra.gmra.mrb[0].mxu0 %vm378_vm3, %v576_v8  ;;  %v831_v34 = vsel %vm382_vm2, %v824_v31, 0 }
 0x128   : > { %721 = vmatpush1.bf16.msra.mxu0 %v712_v23  ;;  %752 = vmatprep.mubr.bf16.mxu0 %v1752_v1 }
 0x129   : > { %v935_v25 = vpop.permute.xlu0 %934  ;;  %v820_v26 = vpop.permute.xlu1 %819 }
 0x12a   : > { %v825_v27 = vsel %vm823_vm6, %v818_v18, %v820_v26  ;;  %v826_v36 = vsel %vm823_vm6, %v820_v26, %v822_v21 }
 0x12b   : > { %1611 = vmatmul.mubr.msk.bf16.vlgmr.msra.gmra.mrb[0].mxu1 %vm378_vm3, %v576_v8  ;;  %1556 = vmatprep.subr.msk.bf16.mxu0 %vm382_vm2, %v825_v27  ;;  %v837_v39 = vsel %vm382_vm2, %v826_v36, 0 }
 0x12c   : > { %1615 = vmatpush3.bf16.msra.mxu1 %v718_v28  ;;  %1616 = vmatprep.mubr.msk.bf16.mxu1 %vm1756_vm0, %v1754_v38 }
 0x12d   : > { %v939_v29 = vpop.permute.xlu0 %938  ;;  %v814_v30 = vpop.permute.xlu1 %813  ;;  %1620 = vmatprep.subr.bf16.mxu1 %v1754_v38 }
 0x131   : > { %v937_v32 = vpop.permute.xlu1 %936  ;;  %v933_v35 = vpop.permute.xlu0 %932 }
 0x132   : > { %v944_v33 = vsel %vm942_vm7, %v937_v32, %v939_v29  ;;  %v943_v42 = vsel %vm942_vm7, %v935_v25, %v937_v32 }
 0x133   : > { %1553 = vmatmul.mubr.msk.bf16.vlgmr.msra.gmra.mrb[0].mxu0 %vm378_vm3, %v695_v13  ;;  %v950_v45 = vsel %vm382_vm2, %v943_v42, 0 }
 0x134   : > { %840 = vmatpush1.bf16.msra.mxu0 %v831_v34  ;;  %871 = vmatprep.mubr.bf16.mxu0 %v1752_v1 }
 0x135   : > { %1560 = vmatprep.subr.msk.bf16.mxu0 %vm382_vm2, %v944_v33  ;;  %v941_v37 = vpop.permute.xlu1 %940  ;;  %v1056_v40 = vpop.permute.xlu0 %1055 }
 0x136   : > { %v945_v47 = vsel %vm942_vm7, %v939_v29, %v941_v37 }
 0x137   : > { %1617 = vmatmul.mubr.msk.bf16.vlgmr.msra.gmra.mrb[0].mxu1 %vm378_vm3, %v695_v13  ;;  %v956_v49 = vsel %vm382_vm2, %v945_v47, 0 }
 0x138   : > { %1621 = vmatpush3.bf16.msra.mxu1 %v837_v39  ;;  %1622 = vmatprep.mubr.msk.bf16.mxu1 %vm1756_vm0, %v1754_v38 }
 0x139   : > { %v1054_v41 = vpop.permute.xlu1 %1053  ;;  %1626 = vmatprep.subr.bf16.mxu1 %v1754_v38  ;;  %v1060_v46 = vpop.permute.xlu0 %1059 }
 0x13a   : > { %v1062_v52 = vsel %vm1061_vm8, %v1054_v41, %v1056_v40 }
 0x13b   : > { %v1069_v54 = vsel %vm382_vm2, %v1062_v52, 0 }
 0x13d   : > { %v1058_v43 = vpop.permute.xlu1 %1057  ;;  %v1173_v50 = vpop.permute.xlu0 %1172 }
 0x13e   : > { %v1063_v44 = vsel %vm1061_vm8, %v1056_v40, %v1058_v43  ;;  %v1064_v56 = vsel %vm1061_vm8, %v1058_v43, %v1060_v46 }
 0x13f   : > { %1557 = vmatmul.mubr.msk.bf16.vlgmr.msra.gmra.mrb[0].mxu0 %vm378_vm3, %v814_v30  ;;  %v1075_v58 = vsel %vm382_vm2, %v1064_v56, 0 }
 0x140   : > { %959 = vmatpush1.bf16.msra.mxu0 %v950_v45  ;;  %990 = vmatprep.mubr.bf16.mxu0 %v1752_v1 }
 0x141   : > { %1564 = vmatprep.subr.msk.bf16.mxu0 %vm382_vm2, %v1063_v44  ;;  %v1052_v48 = vpop.permute.xlu1 %1051  ;;  %v1177_v55 = vpop.permute.xlu0 %1176 }
 0x143   : > { %1623 = vmatmul.mubr.msk.bf16.vlgmr.msra.gmra.mrb[0].mxu1 %vm378_vm3, %v814_v30 }
 0x144   : > { %1627 = vmatpush3.bf16.msra.mxu1 %v956_v49  ;;  %1628 = vmatprep.mubr.msk.bf16.mxu1 %vm1756_vm0, %v1754_v38 }
 0x145   : > { %v1175_v51 = vpop.permute.xlu1 %1174  ;;  %1632 = vmatprep.subr.bf16.mxu1 %v1754_v38  ;;  %v1171_v60 = vpop.permute.xlu0 %1170 }
 0x146   : > { %v1182_v57 = vsel %vm1180_vm9, %v1175_v51, %v1177_v55  ;;  %v1181_v61 = vsel %vm1180_vm9, %v1173_v50, %v1175_v51 }
 0x147   : > { %v1188_v63 = vsel %vm382_vm2, %v1181_v61, 0 }
 0x149   : > { %v1179_v53 = vpop.permute.xlu1 %1178  ;;  %v1294_v0 = vpop.permute.xlu0 %1293 }
 0x14a   : > { %v1183_v2 = vsel %vm1180_vm9, %v1177_v55, %v1179_v53 }
 0x14b   : > { %1561 = vmatmul.mubr.msk.bf16.vlgmr.msra.gmra.mrb[0].mxu0 %vm378_vm3, %v933_v35  ;;  %v1194_v4 = vsel %vm382_vm2, %v1183_v2, 0 }
 0x14c   : > { %1078 = vmatpush1.bf16.msra.mxu0 %v1069_v54  ;;  %1109 = vmatprep.mubr.bf16.mxu0 %v1752_v1 }
 0x14d   : > { %1568 = vmatprep.subr.msk.bf16.mxu0 %vm382_vm2, %v1182_v57  ;;  %v1292_v59 = vpop.permute.xlu1 %1291  ;;  %v1298_v7 = vpop.permute.xlu0 %1297 }
 0x14e   : > { %v1300_v5 = vsel %vm1299_vm10, %v1292_v59, %v1294_v0 }
 0x14f   : > { %1629 = vmatmul.mubr.msk.bf16.vlgmr.msra.gmra.mrb[0].mxu1 %vm378_vm3, %v933_v35  ;;  %v1307_v8 = vsel %vm382_vm2, %v1300_v5, 0 }
 0x150   : > { %1633 = vmatpush3.bf16.msra.mxu1 %v1075_v58  ;;  %1634 = vmatprep.mubr.msk.bf16.mxu1 %vm1756_vm0, %v1754_v38 }
 0x151   : > { %1638 = vmatprep.subr.bf16.mxu1 %v1754_v38  ;;  %v1296_v62 = vpop.permute.xlu1 %1295 }
 0x152   : > { %v1301_v3 = vsel %vm1299_vm10, %v1294_v0, %v1296_v62  ;;  %v1302_v9 = vsel %vm1299_vm10, %v1296_v62, %v1298_v7 }
 0x153   : > { %v1313_v10 = vsel %vm382_vm2, %v1302_v9, 0 }
 0x155   : > { %v1290_v13 = vpop.permute.xlu1 %1289 }
 0x157   : > { %1565 = vmatmul.mubr.msk.bf16.vlgmr.msra.gmra.mrb[0].mxu0 %vm378_vm3, %v1052_v48 }
 0x158   : > { %1197 = vmatpush1.bf16.msra.mxu0 %v1188_v63  ;;  %1228 = vmatprep.mubr.bf16.mxu0 %v1752_v1 }
 0x159   : > { %1572 = vmatprep.subr.msk.bf16.mxu0 %vm382_vm2, %v1301_v3 }
 0x15b   : > { %1635 = vmatmul.mubr.msk.bf16.vlgmr.msra.gmra.mrb[0].mxu1 %vm378_vm3, %v1052_v48 }
 0x15c   : > { %1639 = vmatpush3.bf16.msra.mxu1 %v1194_v4  ;;  %1640 = vmatprep.mubr.msk.bf16.mxu1 %vm1756_vm0, %v1754_v38 }
 0x15d   : > { %1644 = vmatprep.subr.bf16.mxu1 %v1754_v38 }
 0x163   : > { %1569 = vmatmul.mubr.msk.bf16.vlgmr.msra.gmra.mrb[0].mxu0 %vm378_vm3, %v1171_v60 }
 0x164   : > { %1316 = vmatpush1.bf16.msra.mxu0 %v1307_v8  ;;  %1347 = vmatprep.mubr.bf16.mxu0 %v1752_v1  ;;  %v1410_v1 = vrot.slane %v1405_v14, %v325_v11 }
 0x167   : > { %1641 = vmatmul.mubr.msk.bf16.vlgmr.msra.gmra.mrb[0].mxu1 %vm378_vm3, %v1171_v60 }
 0x168   : > { %1645 = vmatpush3.bf16.msra.mxu1 %v1313_v10  ;;  %1646 = vmatprep.mubr.msk.bf16.mxu1 %vm1756_vm0, %v1754_v38  ;;  %v1418_v38 = vrot.slane %v1405_v14, %v333_v12 }
 0x16f   : > { %1573 = vmatmul.mubr.msk.bf16.vlgmr.msra.gmra.mrb[0].mxu0 %vm378_vm3, %v1290_v13 }
 0x173   : > { %1647 = vmatmul.mubr.msk.bf16.vlgmr.msra.gmra.mrb[0].mxu1 %vm378_vm3, %v1290_v13 }
 0x242   : > { %v1349_v16 = vpop.f32.mrb[0].mxu0 }
 0x243   : > { %v1422_v18 = vmul.f32 %v1410_v1, %v1349_v16  ;;  %v1351_v19 = vpop.f32.mrb[1].mxu0 }
 0x244   : > { %v1401_v20 = vcombine.low %v1349_v16, %v1351_v19  ;;  %v1423_v21 = vmul.f32 %v1414_v15, %v1351_v19  ;;  %v1353_v22 = vpop.f32.mrb[2].mxu0 }
 0x245   : > { %v1432_v23 = vmul.f32 %v1422_v18, %v1349_v16  ;;  %v1354_v24 = vpop.f32.mrb[3].mxu0  ;;  %v1425_v11 = vsel %vm382_vm2, %v1422_v18, 0.0 }
 0x246   : > { %v1433_v25 = vmul.f32 %v1423_v21, %v1351_v19  ;;  %v1390_v26 = vpop.f32.mrb[0].mxu1  ;;  %1403 = vst [vmem:[%s285_s17] sm:$0xff] %v1401_v20  ;;  %v1426_v17 = vsel %vm382_vm2, %v1423_v21, 0.0 }
 0x247   : > { %1404 = vst [vmem:[%s285_s17 + $0x8] sm:$0xf] %v1390_v26  ;;  %v1424_v27 = vmul.f32 %v1418_v38, %v1390_v26  ;;  %v1648_v28 = vpop.f32.mrb[1].mxu1  ;;  %v1427_v29 = vadd.f32 %v1426_v17, %v1425_v11  ;;  %v1435_v6 = vsel %vm382_vm2, %v1432_v23, 0.0 }
 0x248   : > { %v1393_v12 = vpop.f32.mrb[2].mxu1  ;;  %v1436_v30 = vsel %vm382_vm2, %v1433_v25, 0.0 }
 0x249   : > { %v1434_v31 = vmul.f32 %v1424_v27, %v1390_v26  ;;  %v1649_v32 = vpop.f32.mrb[3].mxu1  ;;  %v1428_v33 = vsel %vm382_vm2, %v1424_v27, 0.0  ;;  %v1437_v34 = vadd.f32 %v1436_v30, %v1435_v6 }
 0x24a   : > { %v1429_v35 = vadd.f32 %v1428_v33, %v1427_v29 }
 0x24b   : > { %v1438_v36 = vsel %vm382_vm2, %v1434_v31, 0.0 }
 0x24c   : > { %1430 = vadd.xlane.f32.xlu0 %v1429_v35  ;;  %v1439_v37 = vadd.f32 %v1438_v36, %v1437_v34 }
 0x24e   : > { %1440 = vadd.xlane.f32.xlu1 %v1439_v37 }
 0x2d9   : > { %v1431_v39 = vpop.xlane.xlu0 %1430 }
 0x2db   : > { %v1441_v40 = vpop.xlane.xlu1 %1440 }
 0x2dc   : > { %v1443_v41 = vsel %vm1442_vm11, %v1431_v39, %v1441_v40 }
 0x2dd   : > { %1445 = vst.msk [vmem:[%s289_s21] sm:$0xf] %vm1444_vm12, %v1443_v41 }
 0x2de PF: > { %s18_s24 = sadd.s32 1, %s1750_s24  }
 0x2df   : > { %p15_p4 = scmp.ge.s32.totalorder %s18_s24, 4  }
 0x2e1   :  { %17 = sbr.rel (!%p15_p4) target bundleno = 1 (0x1), region = 86 }

</bundles_post_ra>
